<compile_context>
chip_gen: v7x
topology: tpu7x:2x2x1
jax: 0.10.0
libtpu: 0.0.40
codegen_flags: <defaults>
</compile_context>

<pallas_src>
import jax
import jax.numpy as jnp
import numpy as np
from jax.experimental import pallas as pl
from jax.experimental.pallas import tpu as pltpu

# f32 matmuls on the MXU are emulated with bf16 passes; pin the pass count so
# speed/accuracy are explicit.  HIGHEST guarantees the 1e-4 tolerance vs. the
# double-precision PyTorch reference on every generation; Precision.HIGH is
# ~2x faster and usually sufficient for |F| ~ 1/sqrt(N) ortho DFT matrices —
# validate against the tolerance before switching.
_MATMUL_PRECISION = jax.lax.Precision.HIGHEST


def _dc_kernel(pred_ref, kmr_ref, kmi_ref, mask_ref, fh_ref, fwc_ref,
               out_ref, ab_scr, uv_scr):
    """One group of G images per grid step.

    pred_ref : (G, Hp, Wp)   zero-padded real images
    kmr_ref  : (G, Hp, Wp)   measured k-space, real part (zero-padded)
    kmi_ref  : (G, Hp, Wp)   measured k-space, imag part (zero-padded)
    mask_ref : (Hp, Wp)      sampling mask (zero-padded)
    fh_ref   : (2Hp, Hp)     [fhr ; fhi]  ortho DFT along H (row-stacked re/im)
    fwc_ref  : (Wp, 2Wp)     [fwr | fwi]  ortho DFT along W (lane-concatenated)
    out_ref  : (G, Hp, Wp)   real part of the data-consistent images
    ab_scr   : (G*2Hp, Wp)   scratch: row-stacked fh @ x_g
    uv_scr   : (G*Hp, 2Wp)   scratch: row-stacked [Re | Im] of conj(F_H) @ U_g
    """
    g_fold, hp, wp = pred_ref.shape
    prec = _MATMUL_PRECISION

    fh = fh_ref[...]        # (2Hp, Hp)
    fwc = fwc_ref[...]      # (Wp, 2Wp)
    m = mask_ref[...]       # (Hp, Wp)

    # -- Stage 1: H-side forward DFT (contracts H); per image (K = Hp is small
    #    no matter how we fold), row-stacked into scratch for stage 2.
    for g in range(g_fold):
        ab_scr[2 * hp * g:2 * hp * (g + 1), :] = jnp.dot(
            fh, pred_ref[g], preferred_element_type=jnp.float32, precision=prec)

    # -- Stage 2: W-side forward DFT, fused across all folded images (M = G*2Hp).
    p = jnp.dot(ab_scr[...], fwc,
                preferred_element_type=jnp.float32, precision=prec)   # (G*2Hp, 2Wp)

    # -- Stage 3: data-consistency blend + H-side inverse DFT (per image).
    for g in range(g_fold):
        a = p[2 * hp * g:2 * hp * g + hp, :]          # (fhr@x) @ [fwr | fwi]
        b = p[2 * hp * g + hp:2 * hp * (g + 1), :]    # (fhi@x) @ [fwr | fwi]
        kr = a[:, :wp] - b[:, wp:]                    # Re(K_pred)
        ki = a[:, wp:] + b[:, :wp]                    # Im(K_pred)
        # u = k_pred + m * (k_meas - k_pred)   (3 VALU ops, no (1-m) temporary)
        ur = kr + m * (kmr_ref[g] - kr)
        ui = ki + m * (kmi_ref[g] - ki)
        phr = jnp.dot(fh, ur, preferred_element_type=jnp.float32, precision=prec)  # (2Hp, Wp)
        phi = jnp.dot(fh, ui, preferred_element_type=jnp.float32, precision=prec)  # (2Hp, Wp)
        # conj(F_H) @ U :  Re = fhr@ur + fhi@ui ,  Im = fhr@ui - fhi@ur
        # 128-aligned lane-slice stores -> no jnp.concatenate copies.
        uv_scr[hp * g:hp * (g + 1), :wp] = phr[:hp, :] + phi[hp:, :]
        uv_scr[hp * g:hp * (g + 1), wp:] = phi[:hp, :] - phr[hp:, :]

    # -- Stage 4: W-side inverse DFT, fused across images (M = G*Hp).
    #    real(P @ conj(F_W)) = pr@fwr + pi@fwi = [pr | pi] @ fwc.T
    #    (ortho DFT matrices are symmetric), expressed as an NT dot_general so
    #    the separate fws operand is not needed.
    out = jax.lax.dot_general(
        uv_scr[...], fwc, dimension_numbers=(((1,), (1,)), ((), ())),
        preferred_element_type=jnp.float32, precision=prec)            # (G*Hp, Wp)
    for g in range(g_fold):
        out_ref[g] = out[hp * g:hp * (g + 1), :]


def _round_up(x, m):
    return (x + m - 1) // m * m


def _ortho_dft(n, n_pad):
    """Ortho (1/sqrt(n)) forward DFT matrix of size n, zero-padded to (n_pad, n_pad)."""
    idx = np.arange(n)
    ang = -2.0 * np.pi * np.outer(idx, idx) / n
    s = 1.0 / np.sqrt(n)
    re = np.zeros((n_pad, n_pad), np.float32)
    im = np.zeros((n_pad, n_pad), np.float32)
    re[:n, :n] = np.cos(ang) * s
    im[:n, :n] = np.sin(ang) * s
    return re, im


def _default_vmem_limit_bytes():
    """~3/4 of physical VMEM: ≈96 MiB on v5e/v6e (128 MiB), ≈48 MiB on v7x (64 MiB)."""
    cap = None
    try:
        cap = getattr(pltpu.get_tpu_info(), "vmem_capacity_bytes", None)
    except Exception:
        cap = None
    if not cap:
        cap = 64 * 1024 * 1024          # conservative (v7x-sized) fallback
    return int(cap) * 3 // 4


def _pick_group_size(batch, hp, wp, vmem_limit_bytes):
    """Images folded per grid step: keep >= 2 grid steps (v7x dual TensorCore)
    and bound folded VMEM (~80 B/element/image of blocks+scratch+intermediates)."""
    if batch <= 2:
        return 1
    per_image = 80 * hp * wp
    budget = vmem_limit_bytes // 2
    g = 1
    for cand in (2, 4, 8):
        if batch % cand == 0 and batch // cand >= 2 and cand * per_image <= budget:
            g = cand
    return g


def _invariant_spec(shape):
    """Grid-invariant operand: single-buffered (no double-buffer VMEM) when supported."""
    zero_map = lambda b: (0,) * len(shape)
    try:
        return pl.BlockSpec(shape, zero_map, pipeline_mode=pl.Buffered(1))
    except (TypeError, AttributeError):
        # Older jax without BlockSpec(pipeline_mode=...) / pl.Buffered:
        # identical math, default double-buffering of the invariant operand.
        return pl.BlockSpec(shape, zero_map)


def data_consistency_layer(predicted_img, us_kspace, us_mask, *,
                           group_size=None, vmem_limit_bytes=None):
    """predicted_img: (B,1,H,W) f32; us_kspace: (B,1,H,W,2) f32; us_mask: (1,H,W,1) f32
       returns (B,1,H,W) f32."""
    B, _, H, W = predicted_img.shape
    Hp = _round_up(H, 8)       # sublane dim only needs a multiple of 8 (no 128 floor)
    Wp = _round_up(W, 128)     # lane dim needs 128 (unmasked vst, full MXU tiles)

    if vmem_limit_bytes is None:
        vmem_limit_bytes = _default_vmem_limit_bytes()

    pred = predicted_img[:, 0].astype(jnp.float32)          # (B,H,W)
    kmr = us_kspace[:, 0, :, :, 0].astype(jnp.float32)      # (B,H,W)
    kmi = us_kspace[:, 0, :, :, 1].astype(jnp.float32)      # (B,H,W)
    mask = us_mask[0, :, :, 0].astype(jnp.float32)          # (H,W)

    if (Hp, Wp) != (H, W):                                  # pad only when needed
        pad3 = ((0, 0), (0, Hp - H), (0, Wp - W))
        pred = jnp.pad(pred, pad3)
        kmr = jnp.pad(kmr, pad3)
        kmi = jnp.pad(kmi, pad3)
        mask = jnp.pad(mask, ((0, Hp - H), (0, Wp - W)))

    G = group_size if group_size is not None else _pick_group_size(
        B, Hp, Wp, vmem_limit_bytes)
    Bp = _round_up(B, G)
    if Bp != B:                                             # zero images are harmless
        padb = ((0, Bp - B), (0, 0), (0, 0))
        pred = jnp.pad(pred, padb)
        kmr = jnp.pad(kmr, padb)
        kmi = jnp.pad(kmi, padb)
    n_groups = Bp // G

    fhr, fhi = _ortho_dft(H, Hp)
    fwr, fwi = _ortho_dft(W, Wp)
    fh_stk = jnp.asarray(np.concatenate([fhr, fhi], axis=0))   # (2Hp, Hp)
    fw_cat = jnp.asarray(np.concatenate([fwr, fwi], axis=1))   # (Wp, 2Wp)

    per_grp = pl.BlockSpec((G, Hp, Wp), lambda b: (b, 0, 0))

    out_p = pl.pallas_call(
        _dc_kernel,
        out_shape=jax.ShapeDtypeStruct((Bp, Hp, Wp), jnp.float32),
        grid_spec=pltpu.PrefetchScalarGridSpec(
            num_scalar_prefetch=0,
            grid=(n_groups,),
            in_specs=[per_grp, per_grp, per_grp,
                      _invariant_spec((Hp, Wp)),
                      _invariant_spec((2 * Hp, Hp)),
                      _invariant_spec((Wp, 2 * Wp))],
            out_specs=per_grp,
            scratch_shapes=[pltpu.VMEM((G * 2 * Hp, Wp), jnp.float32),
                            pltpu.VMEM((G * Hp, 2 * Wp), jnp.float32)]),
        compiler_params=pltpu.CompilerParams(
            dimension_semantics=("parallel",),
            vmem_limit_bytes=int(vmem_limit_bytes)),
    )(pred, kmr, kmi, mask, fh_stk, fw_cat)

    return out_p[:B, :H, :W][:, None]                        # (B,1,H,W)


def _reference(predicted_img, us_kspace, us_mask):
    pred = predicted_img[:, 0, :, :]
    k_pred = jnp.fft.fft2(pred, norm="ortho")                # ortho == normalized=True
    k_meas = us_kspace[:, 0, :, :, 0] + 1j * us_kspace[:, 0, :, :, 1]
    m = us_mask[0, :, :, 0]
    updated = m * k_meas + (1.0 - m) * k_pred
    img = jnp.fft.ifft2(updated, norm="ortho")
    return jnp.real(img)[:, None, :, :].astype(jnp.float32)


if __name__ == "__main__":
    B, H, W = 2, 16, 16
    key = jax.random.PRNGKey(0)
    k1, k2, k3 = jax.random.split(key, 3)

    predicted_img = jax.random.normal(k1, (B, 1, H, W), dtype=jnp.float32)
    us_kspace = jax.random.normal(k2, (B, 1, H, W, 2), dtype=jnp.float32)
    us_mask = (jax.random.uniform(k3, (1, H, W, 1)) < 0.3).astype(jnp.float32)

    out = data_consistency_layer(predicted_img, us_kspace, us_mask)
    out = jax.block_until_ready(out)

    ref = _reference(predicted_img, us_kspace, us_mask)
    assert out.shape == (B, 1, H, W)
    np.testing.assert_allclose(np.asarray(out), np.asarray(ref), atol=1e-4, rtol=1e-4)

    print("KERNEL_OK")
</pallas_src>

<mosaic_0001>
module attributes {stable_mosaic.version = 11 : i64} {
  func.func @_dc_kernel(%arg0: i32, %arg1: memref<1x16x128xf32, #tpu.memory_space<vmem>>, %arg2: memref<1x16x128xf32, #tpu.memory_space<vmem>>, %arg3: memref<1x16x128xf32, #tpu.memory_space<vmem>>, %arg4: memref<16x128xf32, #tpu.memory_space<vmem>>, %arg5: memref<32x16xf32, #tpu.memory_space<vmem>>, %arg6: memref<128x256xf32, #tpu.memory_space<vmem>>, %arg7: memref<1x16x128xf32, #tpu.memory_space<vmem>>, %arg8: memref<32x128xf32, #tpu.memory_space<vmem>>, %arg9: memref<16x256xf32, #tpu.memory_space<vmem>>) attributes {dimension_semantics = [#tpu.dimension_semantics<parallel>], iteration_bounds = array<i64: 2>, scalar_prefetch = 0 : i64, scratch_operands = 2 : i64, tpu.core_type = #tpu.core_type<tc>, window_params = [{transform_indices = @transform_0, window_bounds = array<i64: 1, 16, 128>}, {transform_indices = @transform_1, window_bounds = array<i64: 1, 16, 128>}, {transform_indices = @transform_2, window_bounds = array<i64: 1, 16, 128>}, {pipeline_mode = #tpu.pipeline_mode<synchronous>, transform_indices = @transform_3, window_bounds = array<i64: 16, 128>}, {pipeline_mode = #tpu.pipeline_mode<synchronous>, transform_indices = @transform_4, window_bounds = array<i64: 32, 16>}, {pipeline_mode = #tpu.pipeline_mode<synchronous>, transform_indices = @transform_5, window_bounds = array<i64: 128, 256>}, {transform_indices = @transform_6, window_bounds = array<i64: 1, 16, 128>}]} {
    %c0 = arith.constant 0 : index
    %c0_0 = arith.constant 0 : index
    %0 = vector.load %arg5[%c0, %c0_0] : memref<32x16xf32, #tpu.memory_space<vmem>>, vector<32x16xf32>
    %c0_1 = arith.constant 0 : index
    %c0_2 = arith.constant 0 : index
    %1 = vector.load %arg6[%c0_1, %c0_2] : memref<128x256xf32, #tpu.memory_space<vmem>>, vector<128x256xf32>
    %c0_3 = arith.constant 0 : index
    %c0_4 = arith.constant 0 : index
    %2 = vector.load %arg4[%c0_3, %c0_4] : memref<16x128xf32, #tpu.memory_space<vmem>>, vector<16x128xf32>
    %c0_5 = arith.constant 0 : index
    %c0_6 = arith.constant 0 : index
    %c0_7 = arith.constant 0 : index
    %3 = vector.load %arg1[%c0_5, %c0_6, %c0_7] : memref<1x16x128xf32, #tpu.memory_space<vmem>>, vector<1x16x128xf32>
    %4 = vector.shape_cast %3 : vector<1x16x128xf32> to vector<16x128xf32>
    %cst = arith.constant dense<0.000000e+00> : vector<32x128xf32>
    %5 = tpu.matmul %0, %4, %cst {dimension_numbers = #tpu.dot_dimension_numbers<[1], [0], [0], [1], [0, 0, 1, 1], [], []>, precision = #tpu.contract_precision<fp32>} : vector<32x16xf32>, vector<16x128xf32>, vector<32x128xf32> -> vector<32x128xf32>
    %c0_8 = arith.constant 0 : index
    %c0_9 = arith.constant 0 : index
    %6 = vector.load %arg8[%c0_8, %c0_9] : memref<32x128xf32, #tpu.memory_space<vmem>>, vector<32x128xf32>
    tpu.vector_store %arg8[%c0_8, %c0_9], %5 {strides = array<i32>} : memref<32x128xf32, #tpu.memory_space<vmem>>, vector<32x128xf32>,
    %c0_10 = arith.constant 0 : index
    %c0_11 = arith.constant 0 : index
    %7 = vector.load %arg8[%c0_10, %c0_11] : memref<32x128xf32, #tpu.memory_space<vmem>>, vector<32x128xf32>
    %cst_12 = arith.constant dense<0.000000e+00> : vector<32x256xf32>
    %8 = tpu.matmul %7, %1, %cst_12 {dimension_numbers = #tpu.dot_dimension_numbers<[1], [0], [0], [1], [0, 0, 1, 1], [], []>, precision = #tpu.contract_precision<fp32>} : vector<32x128xf32>, vector<128x256xf32>, vector<32x256xf32> -> vector<32x256xf32>
    %9 = vector.extract_strided_slice %8 {offsets = [0, 0], sizes = [16, 256], strides = [1, 1]} : vector<32x256xf32> to vector<16x256xf32>
    %10 = vector.extract_strided_slice %8 {offsets = [16, 0], sizes = [16, 256], strides = [1, 1]} : vector<32x256xf32> to vector<16x256xf32>
    %11 = vector.extract_strided_slice %9 {offsets = [0, 0], sizes = [16, 128], strides = [1, 1]} : vector<16x256xf32> to vector<16x128xf32>
    %12 = vector.extract_strided_slice %10 {offsets = [0, 128], sizes = [16, 128], strides = [1, 1]} : vector<16x256xf32> to vector<16x128xf32>
    %13 = arith.subf %11, %12 : vector<16x128xf32>
    %14 = vector.extract_strided_slice %9 {offsets = [0, 128], sizes = [16, 128], strides = [1, 1]} : vector<16x256xf32> to vector<16x128xf32>
    %15 = vector.extract_strided_slice %10 {offsets = [0, 0], sizes = [16, 128], strides = [1, 1]} : vector<16x256xf32> to vector<16x128xf32>
    %16 = arith.addf %14, %15 : vector<16x128xf32>
    %c0_13 = arith.constant 0 : index
    %c0_14 = arith.constant 0 : index
    %c0_15 = arith.constant 0 : index
    %17 = vector.load %arg2[%c0_13, %c0_14, %c0_15] : memref<1x16x128xf32, #tpu.memory_space<vmem>>, vector<1x16x128xf32>
    %18 = vector.shape_cast %17 : vector<1x16x128xf32> to vector<16x128xf32>
    %19 = arith.subf %18, %13 : vector<16x128xf32>
    %20 = arith.mulf %2, %19 : vector<16x128xf32>
    %21 = arith.addf %13, %20 : vector<16x128xf32>
    %c0_16 = arith.constant 0 : index
    %c0_17 = arith.constant 0 : index
    %c0_18 = arith.constant 0 : index
    %22 = vector.load %arg3[%c0_16, %c0_17, %c0_18] : memref<1x16x128xf32, #tpu.memory_space<vmem>>, vector<1x16x128xf32>
    %23 = vector.shape_cast %22 : vector<1x16x128xf32> to vector<16x128xf32>
    %24 = arith.subf %23, %16 : vector<16x128xf32>
    %25 = arith.mulf %2, %24 : vector<16x128xf32>
    %26 = arith.addf %16, %25 : vector<16x128xf32>
    %cst_19 = arith.constant dense<0.000000e+00> : vector<32x128xf32>
    %27 = tpu.matmul %0, %21, %cst_19 {dimension_numbers = #tpu.dot_dimension_numbers<[1], [0], [0], [1], [0, 0, 1, 1], [], []>, precision = #tpu.contract_precision<fp32>} : vector<32x16xf32>, vector<16x128xf32>, vector<32x128xf32> -> vector<32x128xf32>
    %cst_20 = arith.constant dense<0.000000e+00> : vector<32x128xf32>
    %28 = tpu.matmul %0, %26, %cst_20 {dimension_numbers = #tpu.dot_dimension_numbers<[1], [0], [0], [1], [0, 0, 1, 1], [], []>, precision = #tpu.contract_precision<fp32>} : vector<32x16xf32>, vector<16x128xf32>, vector<32x128xf32> -> vector<32x128xf32>
    %29 = vector.extract_strided_slice %27 {offsets = [0, 0], sizes = [16, 128], strides = [1, 1]} : vector<32x128xf32> to vector<16x128xf32>
    %30 = vector.extract_strided_slice %28 {offsets = [16, 0], sizes = [16, 128], strides = [1, 1]} : vector<32x128xf32> to vector<16x128xf32>
    %31 = arith.addf %29, %30 : vector<16x128xf32>
    %c0_21 = arith.constant 0 : index
    %c0_22 = arith.constant 0 : index
    %32 = vector.load %arg9[%c0_21, %c0_22] : memref<16x256xf32, #tpu.memory_space<vmem>>, vector<16x128xf32>
    tpu.vector_store %arg9[%c0_21, %c0_22], %31 {strides = array<i32>} : memref<16x256xf32, #tpu.memory_space<vmem>>, vector<16x128xf32>,
    %33 = vector.extract_strided_slice %28 {offsets = [0, 0], sizes = [16, 128], strides = [1, 1]} : vector<32x128xf32> to vector<16x128xf32>
    %34 = vector.extract_strided_slice %27 {offsets = [16, 0], sizes = [16, 128], strides = [1, 1]} : vector<32x128xf32> to vector<16x128xf32>
    %35 = arith.subf %33, %34 : vector<16x128xf32>
    %c0_23 = arith.constant 0 : index
    %c128 = arith.constant 128 : index
    %36 = vector.load %arg9[%c0_23, %c128] : memref<16x256xf32, #tpu.memory_space<vmem>>, vector<16x128xf32>
    tpu.vector_store %arg9[%c0_23, %c128], %35 {strides = array<i32>} : memref<16x256xf32, #tpu.memory_space<vmem>>, vector<16x128xf32>,
    %c0_24 = arith.constant 0 : index
    %c0_25 = arith.constant 0 : index
    %37 = vector.load %arg9[%c0_24, %c0_25] : memref<16x256xf32, #tpu.memory_space<vmem>>, vector<16x256xf32>
    %cst_26 = arith.constant dense<0.000000e+00> : vector<16x128xf32>
    %38 = tpu.matmul %37, %1, %cst_26 {dimension_numbers = #tpu.dot_dimension_numbers<[1], [1], [0], [0], [0, 0, 1, 0], [], []>, precision = #tpu.contract_precision<fp32>} : vector<16x256xf32>, vector<128x256xf32>, vector<16x128xf32> -> vector<16x128xf32>
    %c0_27 = arith.constant 0 : index
    %c0_28 = arith.constant 0 : index
    %c0_29 = arith.constant 0 : index
    %39 = vector.load %arg7[%c0_27, %c0_28, %c0_29] : memref<1x16x128xf32, #tpu.memory_space<vmem>>, vector<1x16x128xf32>
    %40 = vector.shape_cast %39 : vector<1x16x128xf32> to vector<16x128xf32>
    %41 = vector.shape_cast %38 : vector<16x128xf32> to vector<1x16x128xf32>
    tpu.vector_store %arg7[%c0_27, %c0_28, %c0_29], %41 {strides = array<i32>} : memref<1x16x128xf32, #tpu.memory_space<vmem>>, vector<1x16x128xf32>,
    return
  }
  func.func @transform_0(%arg0: i32) -> (i32, i32, i32) {
    %c0_i32 = arith.constant 0 : i32
    %c0_i32_0 = arith.constant 0 : i32
    %c0_i32_1 = arith.constant 0 : i32
    return %arg0, %c0_i32, %c0_i32_0 : i32, i32, i32
  }
  func.func @transform_1(%arg0: i32) -> (i32, i32, i32) {
    %c0_i32 = arith.constant 0 : i32
    %c0_i32_0 = arith.constant 0 : i32
    %c0_i32_1 = arith.constant 0 : i32
    return %arg0, %c0_i32, %c0_i32_0 : i32, i32, i32
  }
  func.func @transform_2(%arg0: i32) -> (i32, i32, i32) {
    %c0_i32 = arith.constant 0 : i32
    %c0_i32_0 = arith.constant 0 : i32
    %c0_i32_1 = arith.constant 0 : i32
    return %arg0, %c0_i32, %c0_i32_0 : i32, i32, i32
  }
  func.func @transform_3(%arg0: i32) -> (i32, i32) {
    %c0_i32 = arith.constant 0 : i32
    %c0_i32_0 = arith.constant 0 : i32
    %c0_i32_1 = arith.constant 0 : i32
    return %c0_i32, %c0_i32_0 : i32, i32
  }
  func.func @transform_4(%arg0: i32) -> (i32, i32) {
    %c0_i32 = arith.constant 0 : i32
    %c0_i32_0 = arith.constant 0 : i32
    %c0_i32_1 = arith.constant 0 : i32
    return %c0_i32, %c0_i32_0 : i32, i32
  }
  func.func @transform_5(%arg0: i32) -> (i32, i32) {
    %c0_i32 = arith.constant 0 : i32
    %c0_i32_0 = arith.constant 0 : i32
    %c0_i32_1 = arith.constant 0 : i32
    return %c0_i32, %c0_i32_0 : i32, i32
  }
  func.func @transform_6(%arg0: i32) -> (i32, i32, i32) {
    %c0_i32 = arith.constant 0 : i32
    %c0_i32_0 = arith.constant 0 : i32
    %c0_i32_1 = arith.constant 0 : i32
    return %arg0, %c0_i32, %c0_i32_0 : i32, i32, i32
  }
}

</mosaic_0001>

<bundles_post_ra>
// kernel: tpu_custom_call.1
= control target key start
LH: loop header
LB: loop body
LE: loop exit
PB: predicated region body
PF: predicated region fallthrough
CT: control target
= control target key end

     0   :  { %s6819_s0 = inlined_call_operand.vmem [shape: f32[2,16,128], index: 0, kind: input, shape index: {}]   ;;  %s6820_s1 = inlined_call_operand.hbm [shape: f32[2,16,128], index: 1, kind: input, shape index: {}]   ;;  %s6821_s2 = inlined_call_operand.hbm [shape: f32[2,16,128], index: 2, kind: input, shape index: {}]   ;;  %s6822_s3 = inlined_call_operand.vmem [shape: f32[16,128], index: 3, kind: input, shape index: {}]   ;;  %s6823_s4 = inlined_call_operand.vmem [shape: f32[32,16], index: 4, kind: input, shape index: {}]   ;;  %s6824_s5 = inlined_call_operand.hbm [shape: f32[128,256], index: 5, kind: input, shape index: {}]   ;;  %s6825_s6 = inlined_call_operand.hbm [shape: f32[2,16,128], index: 6, kind: output, shape index: {}]  }
   0x1   :  { %6963 = sst [smem:[#allocation67_spill]] %s6820_s1 }
   0x2   :  { %6964 = sst [smem:[#allocation68_spill]] %s6824_s5 }
   0x3   :  { %11 = vsyncpa [#allocation5], 0 }
   0x4   :  { %13 = vsyncpa [#allocation5 + $0x1], 0 }
   0x5   :  { %14 = vsyncpa [#allocation8], 0 }
   0x6   :  { %16 = vsyncpa [#allocation8 + $0x1], 0 }
   0x7   :  { %17 = vsyncpa [#allocation6], 0 }
   0x8   :  { %19 = vsyncpa [#allocation6 + $0x1], 0  ;;  %s5423_s21 = smov 0   ;;  %s5425_s22 = smov 0  }
   0x9   :  { %s5427_s23 = smov 0   ;;  %s5429_s24 = smov 0  }
   0xa LB: > { %s5444_s25 = sadd.s32 4294967295, %s5375_s24   ;;  %s4254_s26 = sadd.s32 4294967294, %s5375_s24   ;;  %s5375_s24 = sphi %s5429_s24, %s7171_s24   ;;  %s5371_s23 = sphi %s5427_s23, %s7170_s23   ;;  %s5367_s22 = sphi %s5425_s22, %s7169_s22   ;;  %s5363_s21 = sphi %s5423_s21, %s7168_s21  }
   0xb   : > { %p71_p0 = scmp.ne.s32.totalorder %s5367_s22, %s5363_s21  ;;  %p6826_p1 = scmp.eq.s32.totalorder %s5444_s25, 0 }
   0xc   : > { %p190_p3 = scmp.eq.s32.totalorder %s4254_s26, 1  ;;  %p4255_p5 = scmp.ge.s32.totalorder %s5375_s24, 1 }
   0xd   : > { %p5453_p4 = por %p6826_p1, %p71_p0  ;;  %p197_p7 = scmp.lt.s32.totalorder %s5375_s24, 3 }
   0xe   : > { %p5458_p6 = por %p190_p3, %p71_p0  ;;  %s5377_s30 = smov [#allocation9]  }
   0xf   : > { %s6965_s27 = scalar_select %p5453_p4, 1, 0 }
  0x10   : > { %s6966_s28 = scalar_select %p5458_p6, 1, 0 }
  0x11   : > { %p5463_p8 = pnand %p4255_p5, %p197_p7  ;;  %s215_s7 = sshll.u32 %s5377_s30, 4  ;;  %s5467_s7 = int_to_ptr.vmem [resolvable:$true] %s215_s7 }
  0x12   : > { %s5479_s9 = sadd.s32 1, %s5375_s24   ;;  %s58_s10 = sadd.s32 1, %s5371_s23 }
  0x13   : > { %s6967_s29 = scalar_select %p5463_p8, 1, 0 }
  0x14   : > { %p5154_p9 = pneg %p5463_p8  ;;  %s55_s11 = ssub.s32 %s5375_s24, %s5479_s9 }
  0x15   : > { %s6969_s5 = sld [smem:[#allocation68_spill]] }
  0x16   : > { %p5474_p11 = pnand %p5154_p9, %p6826_p1 }
  0x18   : > { %p5215_p13 = pneg %p5474_p11 }
  0x1b   : > { %s5213_s14 = scalar_lea.hbm %s6969_s5, 4096 }
  0x1c   : > { %p5214_p12 = scmp.ne.s32.totalorder %s6969_s5, %s5213_s14  ;;  %p5220_p5 = scmp.lt.u32.totalorder %s5213_s14, %s6969_s5 }
  0x1e   : > { %p5216_p0 = pnand %p5215_p13, %p5214_p12 }
  0x20   : > { %p5217_p3 = pneg %p5216_p0 }
  0x22   : > { %p5222_p7 = pnand %p5220_p5, %p5217_p3 }
  0x24   : > { %5225 = shalt.err (!%p5222_p7)
}
  0x25   : > { %s5226_s19 = scalar_lea.vmem %s5467_s7, 4096  ;;  %p5234_p2 = scmp.lt.s32.totalorder %s5467_s7, %s5467_s7 }
  0x26   : > { %p5227_p9 = scmp.ne.s32.totalorder %s5467_s7, %s5226_s19  ;;  %p5235_p6 = scmp.lt.s32.totalorder %s5226_s19, %s5226_s19 }
  0x28   : > { %p5229_p10 = pnand %p5227_p9, %p5215_p13  ;;  %p5236_p4 = por %p5235_p6, %p5234_p2 }
  0x2a   : > { %p5230_p1 = pneg %p5229_p10 }
  0x2c   : > { %p5237_p8 = pnand %p5236_p4, %p5230_p1 }
  0x2e   : > { %5240 = shalt.err (!%p5237_p8)
}
  0x2f   : > { %s5378_s20 = smov 256   ;;  %s5379_s26 = smov 16  }
  0x30   : > { %5157 = dma.hbm_to_vmem [thread:$0]  (!%p5474_p11), %s6969_s5, 4096, %s5467_s7, [#allocation8], %s5378_s20, %s5378_s20, %s5379_s26  }
  0x31   : > { %p56_p1 = scmp.eq.s32.totalorder %s55_s11, 0  ;;  %p65_p2 = scmp.ne.s32.totalorder %s5371_s23, %s5367_s22 }
  0x32   : > { %p66_p4 = scmp.eq.s32.totalorder %s5375_s24, 0  ;;  %p5170_p6 = scmp.lt.s32.totalorder %s5375_s24, 2 }
  0x33   : > { %s5510_s13 = scalar_select %p56_p1, %s5371_s23, %s58_s10  }
  0x34   : > { %p67_p8 = por %p66_p4, %p65_p2  ;;  %p6971_p10 = scmp.eq.s32.totalorder %s5444_s25, 1 }
  0x35   : > { %6970 = sst [smem:[#allocation15_spill]] %s5510_s13  ;;  %s237_s15 = sand.u32 1, %s5371_s23  }
  0x36   : > { %p5514_p12 = por %p6971_p10, %p65_p2  ;;  %s4276_s16 = sshll.u32 %s5375_s24, 8 }
  0x37   : > { %s5520_s17 = sshll.u32 %s237_s15, 4  ;;  %s6973_s1 = sld [smem:[#allocation67_spill]] }
  0x38   : > { %s241_s10 = scalar_lea.vmem [#allocation4], %s5520_s17  ;;  %p5530_p11 = pnand %p5170_p6, %p67_p8 }
  0x39   : > { %s248_s11 = sshll.u32 %s241_s10, 4  ;;  %s5536_s20 = scalar_lea.sflag [#allocation5], %s237_s15  ;;  %s5534_s11 = int_to_ptr.vmem [resolvable:$true] %s248_s11 }
  0x3a   : > { %p5243_p0 = pneg %p5530_p11 }
  0x3d   : > { %s5527_s7 = scalar_lea.hbm %s6973_s1, %s4276_s16  ;;  %s5246_s8 = scalar_lea.hbm %s6973_s1, 512 }
  0x3e   : > { %s5241_s26 = scalar_lea.hbm %s5527_s7, 256  ;;  %p5247_p7 = scmp.lt.u32.totalorder %s5527_s7, %s6973_s1 }
  0x3f   : > { %p5242_p13 = scmp.ne.s32.totalorder %s5527_s7, %s5241_s26  ;;  %p5248_p9 = scmp.lt.u32.totalorder %s5246_s8, %s5241_s26 }
  0x40   : > { %p5250_p2 = scmp.lt.u32.totalorder %s5241_s26, %s5527_s7 }
  0x41   : > { %p5244_p3 = pnand %p5243_p0, %p5242_p13  ;;  %p5249_p1 = por %p5248_p9, %p5247_p7 }
  0x43   : > { %p5245_p5 = pneg %p5244_p3  ;;  %p5251_p4 = por %p5250_p2, %p5249_p1 }
  0x45   : > { %p5252_p6 = pnand %p5251_p4, %p5245_p5 }
  0x47   : > { %5255 = shalt.err (!%p5252_p6)
}
  0x48   : > { %s5256_s15 = scalar_lea.vmem %s5534_s11, 256  ;;  %s5380_s30 = smov [#allocation4]  }
  0x49   : > { %p5257_p8 = scmp.ne.s32.totalorder %s5534_s11, %s5256_s15  ;;  %s5261_s12 = sshll.u32 %s5380_s30, 4  ;;  %s5262_s12 = int_to_ptr.vmem [resolvable:$false] %s5261_s12 }
  0x4a   : > { %s5263_s18 = scalar_lea.vmem %s5262_s12, 512  ;;  %p5264_p3 = scmp.lt.s32.totalorder %s5534_s11, %s5262_s12 }
  0x4b   : > { %p5259_p10 = pnand %p5257_p8, %p5243_p0  ;;  %p5265_p7 = scmp.lt.s32.totalorder %s5263_s18, %s5256_s15 }
  0x4d   : > { %p5260_p13 = pneg %p5259_p10  ;;  %p5266_p9 = por %p5265_p7, %p5264_p3 }
  0x4f   : > { %p5267_p1 = pnand %p5266_p9, %p5260_p13 }
  0x51   : > { %5270 = shalt.err (!%p5267_p1)
}
  0x52   : > { %s5381_s26 = smov 128   ;;  %s5382_s8 = smov 8  }
  0x53   : > { %5161 = dma.hbm_to_vmem [thread:$0]  (!%p5530_p11), %s5527_s7, 256, %s5534_s11, %s5536_s20, %s5381_s26, %s5381_s26, %s5382_s8  }
  0x54   : > { %s5572_s30 = scalar_lea.hbm %s6821_s2, %s4276_s16  ;;  %s262_s12 = scalar_lea.vmem [#allocation7], %s5520_s17 }
  0x55   : > { %s269_s18 = sshll.u32 %s262_s12, 4  ;;  %s258_s1 = sand.u32 1, %s5375_s24   ;;  %s5576_s18 = int_to_ptr.vmem [resolvable:$true] %s269_s18 }
  0x56   : > { %s5578_s5 = scalar_lea.sflag [#allocation8], %s258_s1  ;;  %s5271_s13 = scalar_lea.hbm %s5572_s30, 256 }
  0x57   : > { %p5272_p5 = scmp.ne.s32.totalorder %s5572_s30, %s5271_s13  ;;  %s5276_s11 = scalar_lea.hbm %s6821_s2, 512 }
  0x58   : > { %p5277_p6 = scmp.lt.u32.totalorder %s5572_s30, %s6821_s2  ;;  %p5278_p8 = scmp.lt.u32.totalorder %s5276_s11, %s5271_s13 }
  0x59   : > { %p5274_p2 = pnand %p5272_p5, %p5243_p0  ;;  %p5280_p13 = scmp.lt.u32.totalorder %s5271_s13, %s5572_s30 }
  0x5a   : > { %p5279_p10 = por %p5278_p8, %p5277_p6 }
  0x5b   : > { %p5275_p4 = pneg %p5274_p2 }
  0x5c   : > { %p5281_p3 = por %p5280_p13, %p5279_p10 }
  0x5e   : > { %p5282_p7 = pnand %p5281_p3, %p5275_p4 }
  0x60   : > { %5285 = shalt.err (!%p5282_p7)
}
  0x61   : > { %s5286_s1 = scalar_lea.vmem %s5576_s18, 256  ;;  %s5383_s17 = smov [#allocation7]  }
  0x62   : > { %p5287_p9 = scmp.ne.s32.totalorder %s5576_s18, %s5286_s1  ;;  %s5291_s15 = sshll.u32 %s5383_s17, 4  ;;  %s5292_s15 = int_to_ptr.vmem [resolvable:$false] %s5291_s15 }
  0x63   : > { %s5293_s12 = scalar_lea.vmem %s5292_s15, 512  ;;  %p5294_p2 = scmp.lt.s32.totalorder %s5576_s18, %s5292_s15 }
  0x64   : > { %p5289_p1 = pnand %p5287_p9, %p5243_p0  ;;  %p5295_p6 = scmp.lt.s32.totalorder %s5293_s12, %s5286_s1 }
  0x66   : > { %p5290_p5 = pneg %p5289_p1  ;;  %p5296_p8 = por %p5295_p6, %p5294_p2 }
  0x68   : > { %p5297_p10 = pnand %p5296_p8, %p5290_p5 }
  0x6a   : > { %5300 = shalt.err (!%p5297_p10)
}
  0x6b   : > { %5164 = dma.hbm_to_vmem [thread:$0]  (!%p5530_p11), %s5572_s30, 256, %s5576_s18, %s5578_s5, %s5381_s26, %s5381_s26, %s5382_s8  }
  0x6c   : > { %p6975_p0 = scmp.ne.s32.totalorder %s6967_s29, 0 }
  0x6e   : > { %281 = sbr.rel (%p6975_p0) target bundleno = 1446 (0x5a6), region = 44 }
  0x75   : > { %s5610_s13 = sand.u32 1, %s5367_s22   ;;  %p6976_p4 = scmp.ne.s32.totalorder %s6965_s27, 0 }
  0x76   : > { %s5613_s7 = sshll.u32 %s5610_s13, 4  ;;  %s284_s19 = scalar_lea.sflag [#allocation5], %s5610_s13 }
  0x77   : > { %s287_s16 = scalar_lea.vmem [#allocation4], %s5613_s7 }
  0x78   : > { %5346 = dma.done.wait (%p6976_p4), %s284_s19, 256  }
  0x79   : > { %5348 = vsyncadd (%p6976_p4), %s284_s19, 4294967040  ;;  %s292_s5 = sand.u32 1, %s5444_s25   ;;  %s296_s26 = scalar_lea.vmem [#allocation7], %s5613_s7 }
  0x7a   : > { %s293_s29 = scalar_lea.sflag [#allocation8], %s292_s5 }
  0x7b   : > { %5350 = dma.done.wait (%p6976_p4), %s293_s29, 256  }
  0x7c   : > { %5352 = vsyncadd (%p6976_p4), %s293_s29, 4294967040  ;;  %p6977_p11 = scmp.eq.s32.totalorder %s5444_s25, 0 }
  0x7e   : > { %5354 = dma.done.wait (%p6977_p11), [#allocation8], 4096   ;;  %p6978_p13 = pmov %p6977_p11 }
  0x7f   : > { %p339_p3 = scmp.lt.s32.totalorder %s5444_s25, 1  ;;  %vm384_vm0 = vcmask 130048   ;;  %v344_v2 = vld [vmem:[%s6823_s4] sm:$0xff]  ;;  %v345_v6 = vld [vmem:[%s6823_s4 + $0x8] sm:$0xff]  ;;  %v346_v7 = vld [vmem:[%s6823_s4 + $0x10] sm:$0xff]  ;;  %s4279_s11 = sshll.u32 %s5444_s25, 8 }
  0x80   : > { %5356 = vsyncadd (%p6978_p13), [#allocation8], 4294963200  ;;  %v386_v5 = vsel %vm384_vm0, %v344_v2, 0  ;;  %v347_v8 = vld [vmem:[%s6823_s4 + $0x18] sm:$0xff]  ;;  %v389_v10 = vsel %vm384_vm0, %v345_v6, 0  ;;  %v392_v11 = vsel %vm384_vm0, %v346_v7, 0  ;;  %s6775_s10 = scalar_lea.hbm %s6825_s6, %s4279_s11 }
  0x81   : > { %s340_s8 = scalar_select %p339_p3, %s5444_s25, 1  ;;  %v5648_v9 = vand.u32 4294901760, %v386_v5  ;;  %v395_v12 = vsel %vm384_vm0, %v347_v8, 0  ;;  %v5650_v13 = vld [vmem:[#allocation9 + $0x8] sm:$0xff]  ;;  %v5658_v17 = vand.u32 4294901760, %v389_v10  ;;  %v5660_v18 = vld [vmem:[#allocation9 + $0x18] sm:$0xff] }
  0x82   : > { %v5663_v19 = vand.u32 4294901760, %v392_v11  ;;  %v5665_v20 = vand.u32 4294901760, %v395_v12  ;;  %v6851_v25 = vand.u32 4294901760, %v5650_v13  ;;  %v6850_v29 = vand.u32 4294901760, %v5660_v18  ;;  %v5707_v37 = vld [vmem:[#allocation9] sm:$0xff]  ;;  %v5716_v42 = vld [vmem:[#allocation9 + $0x10] sm:$0xff] }
  0x83   : > { %s4278_s30 = sshll.u32 %s340_s8, 4  ;;  %6979 = vst [vmem:[#allocation16_spill] sm:$0xff] %v5648_v9  ;;  %6980 = vst [vmem:[#allocation17_spill] sm:$0xff] %v5658_v17  ;;  %4402 = vmatprep.mubr.f32.mxu0 %v5648_v9  ;;  %v5668_v21 = vsub.f32 %v386_v5, %v5648_v9  ;;  %v5673_v24 = vsub.f32 %v389_v10, %v5658_v17  ;;  %v5729_v47 = vld [vmem:[#allocation9 + $0x28] sm:$0xff]  ;;  %v5731_v48 = vld [vmem:[#allocation9 + $0x38] sm:$0xff]  ;;  %v6846_v52 = vand.u32 4294901760, %v5707_v37 }
  0x84   : > { %s343_s20 = scalar_lea.vmem %s6819_s0, %s4278_s30  ;;  %6981 = vst [vmem:[#allocation18_spill] sm:$0xff] %v5663_v19  ;;  %6982 = vst [vmem:[#allocation19_spill] sm:$0xff] %v5665_v20  ;;  %v5678_v26 = vsub.f32 %v392_v11, %v5663_v19  ;;  %v5681_v27 = vsub.f32 %v395_v12, %v5665_v20  ;;  %v5714_v41 = vsub.f32 %v5650_v13, %v6851_v25  ;;  %v5737_v53 = vld [vmem:[#allocation9 + $0x20] sm:$0xff]  ;;  %v5739_v54 = vld [vmem:[#allocation9 + $0x30] sm:$0xff]  ;;  %v6841_v58 = vand.u32 4294901760, %v5716_v42  ;;  %s5385_s25 = smov [#allocation10]  }
  0x85   : > { %v382_v0 = vld [vmem:[%s343_s20] sm:$0xff]  ;;  %v383_v1 = vld [vmem:[%s343_s20 + $0x8] sm:$0xff]  ;;  %6983 = vst [vmem:[#allocation20_spill] sm:$0xff] %v5668_v21  ;;  %6984 = vst [vmem:[#allocation21_spill] sm:$0xff] %v5673_v24  ;;  %v5684_v28 = vand.u32 4294901760, %v5668_v21  ;;  %v5695_v32 = vand.u32 4294901760, %v5673_v24  ;;  %v5727_v46 = vsub.f32 %v5660_v18, %v6850_v29  ;;  %v5755_v60 = vsub.f32 %v5707_v37, %v6846_v52 }
  0x86   : > { %v398_v3 = vand.u32 4294901760, %v382_v0  ;;  %v401_v4 = vand.u32 4294901760, %v383_v1  ;;  %6985 = vst [vmem:[#allocation22_spill] sm:$0xff] %v5678_v26  ;;  %6986 = vst [vmem:[#allocation23_spill] sm:$0xff] %v5681_v27  ;;  %v5700_v34 = vand.u32 4294901760, %v5678_v26  ;;  %v5703_v35 = vand.u32 4294901760, %v5681_v27 }
  0x87   : > { %6987 = vst [vmem:[#allocation24_spill] sm:$0xff] %v5684_v28  ;;  %6988 = vst [vmem:[#allocation25_spill] sm:$0xff] %v5695_v32  ;;  %v467_v36 = vsub.f32 %v5668_v21, %v5684_v28  ;;  %v477_v40 = vsub.f32 %v5673_v24, %v5695_v32  ;;  %v6835_v51 = vand.u32 4294901760, %v5714_v41  ;;  %v6834_v57 = vand.u32 4294901760, %v5727_v46  ;;  %v5789_v12 = vld [vmem:[#allocation9 + $0x58] sm:$0xff]  ;;  %s5305_s17 = sshll.u32 %s5385_s25, 4  ;;  %s5306_s17 = int_to_ptr.vmem [resolvable:$false] %s5305_s17 }
  0x88   : > { %v5652_v14 = vpack.c.bf16 %v401_v4, %v398_v3  ;;  %v5654_v15 = vsub.f32 %v382_v0, %v398_v3  ;;  %v5656_v16 = vsub.f32 %v383_v1, %v401_v4  ;;  %6989 = vst [vmem:[#allocation26_spill] sm:$0xff] %v5700_v34  ;;  %6990 = vst [vmem:[#allocation27_spill] sm:$0xff] %v5703_v35  ;;  %v6849_v61 = vand.u32 4294901760, %v5729_v47  ;;  %v5770_v3 = vld [vmem:[#allocation9 + $0x48] sm:$0xff]  ;;  %s5307_s15 = scalar_lea.vmem %s5306_s17, 512 }
  0x89   : > { %v5718_v43 = vand.u32 4294901760, %v467_v36  ;;  %v487_v44 = vsub.f32 %v5678_v26, %v5700_v34  ;;  %v497_v45 = vsub.f32 %v5681_v27, %v5703_v35  ;;  %v5733_v50 = vand.u32 4294901760, %v477_v40 }
  0x8a   : > { %v507_v22 = vand.u32 4294901760, %v5654_v15  ;;  %v514_v23 = vand.u32 4294901760, %v5656_v16  ;;  %4569 = vmatprep.subr.bf16.mxu1 %v5652_v14  ;;  %v4576_v33 = vpack.c.bf16 %v5656_v16, %v5654_v15  ;;  %v1137_v59 = vsub.f32 %v5714_v41, %v6835_v51  ;;  %v5848_v51 = vld [vmem:[#allocation9 + $0x68] sm:$0xff] }
  0x8b   : > { %4571 = vmatpush3.bf16.msra.mxu1 %v5652_v14  ;;  %6991 = vst [vmem:[#allocation28_spill] sm:$0xff] %v5718_v43  ;;  %6992 = vst [vmem:[#allocation29_spill] sm:$0xff] %v5733_v50  ;;  %4392 = vmatprep.mubr.f32.mxu1 %v5718_v43  ;;  %v5742_v55 = vand.u32 4294901760, %v487_v44  ;;  %v5744_v56 = vand.u32 4294901760, %v497_v45  ;;  %v6847_v62 = vand.u32 4294901760, %v5731_v48  ;;  %v1149_v63 = vsub.f32 %v5727_v46, %v6834_v57 }
  0x8c   : > { %v508_v30 = vsub.f32 %v5654_v15, %v507_v22  ;;  %v515_v31 = vsub.f32 %v5656_v16, %v514_v23  ;;  %v5766_v0 = vsub.f32 %v5716_v42, %v6841_v58  ;;  %v6839_v1 = vand.u32 4294901760, %v5737_v53 }
  0x8d   : > { %6993 = vst [vmem:[#allocation30_spill] sm:$0xff] %v5742_v55  ;;  %6994 = vst [vmem:[#allocation31_spill] sm:$0xff] %v5744_v56  ;;  %v6838_v2 = vand.u32 4294901760, %v5739_v54  ;;  %v1138_v4 = vand.u32 4294901760, %v1137_v59  ;;  %v6831_v5 = vand.u32 4294901760, %v5755_v60  ;;  %v5776_v6 = vsub.f32 %v5729_v47, %v6849_v61 }
  0x8e   : > { %v509_v38 = vand.u32 4294901760, %v508_v30  ;;  %v516_v39 = vand.u32 4294901760, %v515_v31  ;;  %4393 = vmatmul.mubr.f32.vlgmr.msra.gmra.mrb[0].mxu1 %v5733_v50  ;;  %v1150_v7 = vand.u32 4294901760, %v1149_v63  ;;  %v6829_v8 = vand.u32 4294901760, %v5766_v0 }
  0x8f   : > { %4395 = vmatprep.mubr.f32.mxu1 %v5742_v55  ;;  %v5782_v10 = vsub.f32 %v5731_v48, %v6847_v62  ;;  %v5787_v11 = vsub.f32 %v5737_v53, %v6839_v1  ;;  %v1143_v30 = vsub.f32 %v5755_v60, %v6831_v5  ;;  %v6830_v31 = vand.u32 4294901760, %v5776_v6  ;;  %v5831_v5 = vld [vmem:[#allocation9 + $0x50] sm:$0xff]  ;;  %v5857_v1 = vld [vmem:[#allocation9 + $0x78] sm:$0xff] }
  0x90   : > { %v4572_v49 = vpack.c.bf16 %v516_v39, %v509_v38  ;;  %v5800_v36 = vsub.f32 %v5739_v54, %v6838_v2  ;;  %v6836_v38 = vand.u32 4294901760, %v5770_v3  ;;  %v5804_v39 = vpack.c.bf16 %v1150_v7, %v1138_v4 }
  0x91   : > { %v1155_v40 = vsub.f32 %v5766_v0, %v6829_v8  ;;  %v6832_v44 = vand.u32 4294901760, %v5782_v10  ;;  %v6833_v45 = vand.u32 4294901760, %v5787_v11  ;;  %v1161_v59 = vsub.f32 %v5776_v6, %v6830_v31  ;;  %v5829_v31 = vld [vmem:[#allocation9 + $0x40] sm:$0xff] }
  0x92   : > { %4573 = vmatprep.subr.bf16.mxu0 %v4572_v49  ;;  %4396 = vmatmul.mubr.f32.gmra.mrb[2].mxu1 %v5744_v56  ;;  %6995 = vst [vmem:[#allocation32_spill] sm:$0xff] %v5804_v39  ;;  %v6837_v63 = vand.u32 4294901760, %v5800_v36  ;;  %v6844_v2 = vand.u32 4294901760, %v5831_v5 }
  0x93   : > { %4575 = vmatpush3.bf16.msra.mxu0 %v4572_v49  ;;  %v1144_v49 = vand.u32 4294901760, %v1143_v30  ;;  %4625 = vmatprep.subr.bf16.mxu1 %v5804_v39  ;;  %v1156_v4 = vand.u32 4294901760, %v1155_v40  ;;  %v1173_v7 = vsub.f32 %v5782_v10, %v6832_v44  ;;  %v1167_v8 = vsub.f32 %v5787_v11, %v6833_v45  ;;  %v373_v39 = vld [vmem:[#allocation9 + $0xc8] sm:$0xff] }
  0x94   : > { %4577 = vmatprep.subr.bf16.mxu0 %v4576_v33  ;;  %v5827_v30 = vsub.f32 %v5770_v3, %v6836_v38  ;;  %v5838_v40 = vpack.c.bf16 %v514_v23, %v507_v22  ;;  %v1162_v44 = vand.u32 4294901760, %v1161_v59  ;;  %v1179_v45 = vsub.f32 %v5800_v36, %v6837_v63 }
  0x95   : > { %v5851_v38 = vpack.c.bf16 %v1156_v4, %v1144_v49  ;;  %v1174_v15 = vand.u32 4294901760, %v1173_v7  ;;  %v1168_v16 = vand.u32 4294901760, %v1167_v8  ;;  %v6845_v63 = vand.u32 4294901760, %v5829_v31  ;;  %v5868_v49 = vld [vmem:[#allocation9 + $0x70] sm:$0xff] }
  0x96   : > { %4403 = vmatmul.mubr.f32.vlgmr.msra.gmra.mrb[0].mxu0 %v5658_v17  ;;  %v6843_v22 = vand.u32 4294901760, %v5827_v30  ;;  %v1180_v23 = vand.u32 4294901760, %v1179_v45  ;;  %v6848_v45 = vand.u32 4294901760, %v5848_v51 }
  0x97   : > { %4405 = vmatprep.mubr.f32.mxu0 %v5663_v19  ;;  %4579 = vmatpush3.bf16.msra.mxu0 %v4576_v33  ;;  %v6840_v33 = vand.u32 4294901760, %v5789_v12  ;;  %6996 = vst [vmem:[#allocation33_spill] sm:$0xff] %v5851_v38  ;;  %v5862_v58 = vpack.c.bf16 %v1174_v15, %v1162_v44  ;;  %v5879_v44 = vsub.f32 %v5829_v31, %v6845_v63 }
  0x98   : > { %4581 = vmatprep.subr.bf16.mxu0 %v5652_v14  ;;  %4627 = vmatpush1.bf16.msra.mxu1 %v5851_v38  ;;  %v1185_v8 = vsub.f32 %v5827_v30, %v6843_v22  ;;  %v5871_v4 = vpack.c.bf16 %v1180_v23, %v1168_v16  ;;  %v5884_v15 = vsub.f32 %v5831_v5, %v6844_v2  ;;  %v6852_v23 = vand.u32 4294901760, %v5857_v1 }
  0x99   : > { %v5846_v57 = vsub.f32 %v5789_v12, %v6840_v33  ;;  %v5859_v33 = vld [vmem:[#allocation9 + $0x60] sm:$0xff]  ;;  %6997 = vst [vmem:[#allocation34_spill] sm:$0xff] %v5862_v58  ;;  %4629 = vmatprep.subr.bf16.mxu1 %v5862_v58  ;;  %v6855_v63 = vand.u32 4294901760, %v5879_v44 }
  0x9a   : > { %4406 = vmatmul.mubr.f32.gmra.mrb[2].mxu0 %v5665_v20  ;;  %6998 = vst [vmem:[#allocation35_spill] sm:$0xff] %v5871_v4  ;;  %v1186_v16 = vand.u32 4294901760, %v1185_v8  ;;  %v6853_v22 = vand.u32 4294901760, %v5859_v33  ;;  %v6857_v52 = vand.u32 4294901760, %v5884_v15  ;;  %v6859_v8 = vand.u32 4294901760, %v5868_v49  ;;  %v5936_v58 = vld [vmem:[#allocation9 + $0x80] sm:$0xff] }
  0x9b   : > { %4412 = vmatprep.mubr.f32.mxu0 %v5668_v21  ;;  %v6842_v59 = vand.u32 4294901760, %v5846_v57  ;;  %v1191_v25 = vsub.f32 %v5879_v44, %v6855_v63  ;;  %v5948_v21 = vld [vmem:[#allocation9 + $0x90] sm:$0xff] }
  0x9c   : > { %4631 = vmatpush1.bf16.msra.mxu1 %v5871_v4  ;;  %v5910_v61 = vsub.f32 %v5859_v33, %v6853_v22  ;;  %v5926_v62 = vsub.f32 %v5868_v49, %v6859_v8  ;;  %v5928_v22 = vld [vmem:[#allocation9 + $0x98] sm:$0xff] }
  0x9d   : > { %v1197_v7 = vsub.f32 %v5846_v57, %v6842_v59  ;;  %v5892_v59 = vsub.f32 %v5848_v51, %v6848_v45  ;;  %v5905_v45 = vsub.f32 %v5857_v1, %v6852_v23  ;;  %v1203_v23 = vsub.f32 %v5884_v15, %v6857_v52 }
  0x9e   : > { %4413 = vmatmul.mubr.f32.vlgmr.msra.gmra.mrb[0].mxu0 %v5673_v24  ;;  %v6871_v63 = vand.u32 4294901760, %v5910_v61  ;;  %v1192_v52 = vand.u32 4294901760, %v1191_v25  ;;  %v6873_v8 = vand.u32 4294901760, %v5926_v62 }
  0x9f   : > { %4415 = vmatprep.mubr.f32.mxu0 %v5678_v26  ;;  %4583 = vmatpush3.bf16.msra.mxu0 %v5652_v14  ;;  %v1198_v2 = vand.u32 4294901760, %v1197_v7  ;;  %v5912_v7 = vld [vmem:[#allocation9 + $0x88] sm:$0xff]  ;;  %v6870_v4 = vand.u32 4294901760, %v5905_v45  ;;  %v1204_v38 = vand.u32 4294901760, %v1203_v23 }
  0xa0   : > { %4585 = vmatprep.subr.bf16.mxu0 %v5838_v40  ;;  %v1227_v23 = vsub.f32 %v5926_v62, %v6873_v8 }
  0xa1   : > { %v5915_v29 = vpack.c.bf16 %v1198_v2, %v1186_v16  ;;  %v7000_v2 = vand.u32 4294901760, %v5892_v59  ;;  %v5951_v25 = vpack.c.bf16 %v1204_v38, %v1192_v52  ;;  %v7003_v38 = vand.u32 4294901760, %v5928_v22 }
  0xa2   : > { %4416 = vmatmul.mubr.f32.gmra.mrb[2].mxu0 %v5681_v27  ;;  %v6874_v27 = vand.u32 4294901760, %v5912_v7  ;;  %v1228_v8 = vand.u32 4294901760, %v1227_v23 }
  0xa3   : > { %6999 = vst [vmem:[#allocation36_spill] sm:$0xff] %v5915_v29  ;;  %4422 = vmatprep.mubr.f32.mxu0 %v5684_v28  ;;  %v1209_v16 = vsub.f32 %v5892_v59, %v7000_v2  ;;  %4633 = vmatprep.subr.bf16.mxu1 %v5915_v29  ;;  %v1221_v28 = vsub.f32 %v5905_v45, %v6870_v4  ;;  %7001 = vst [vmem:[#allocation37_spill] sm:$0xff] %v5951_v25 }
  0xa4   : > { %v1215_v2 = vsub.f32 %v5910_v61, %v6871_v63  ;;  %v5962_v63 = vld [vmem:[#allocation9 + $0xa8] sm:$0xff]  ;;  %v5969_v29 = vsub.f32 %v5928_v22, %v7003_v38  ;;  %4635 = vmatpush1.bf16.msra.mxu1 %v5951_v25  ;;  %v7007_v38 = vand.u32 4294901760, %v5650_v13  ;;  %v5994_v25 = vld [vmem:[#allocation9 + $0xb0] sm:$0xff] }
  0xa5   : > { %v1210_v26 = vand.u32 4294901760, %v1209_v16  ;;  %v5959_v16 = vsub.f32 %v5912_v7, %v6874_v27  ;;  %v1222_v24 = vand.u32 4294901760, %v1221_v28  ;;  %v5980_v28 = vld [vmem:[#allocation9 + $0xb8] sm:$0xff]  ;;  %v6890_v4 = vand.u32 4294901760, %v5962_v63 }
  0xa6   : > { %4423 = vmatmul.mubr.f32.vlgmr.msra.gmra.mrb[0].mxu0 %v5695_v32  ;;  %v1216_v52 = vand.u32 4294901760, %v1215_v2  ;;  %7004 = vst [vmem:[#allocation39_spill] sm:$0xff] %v5969_v29  ;;  %v5982_v2 = vld [vmem:[#allocation9 + $0xa0] sm:$0xff]  ;;  %v7008_v32 = vand.u32 4294901760, %v5660_v18  ;;  %v6885_v27 = vand.u32 4294901760, %v5969_v29 }
  0xa7   : > { %7002 = vst [vmem:[#allocation38_spill] sm:$0xff] %v5959_v16  ;;  %4425 = vmatprep.mubr.f32.mxu0 %v5700_v34  ;;  %4587 = vmatpush3.bf16.msra.mxu0 %v5838_v40  ;;  %v7005_v34 = vand.u32 4294901760, %v5936_v58  ;;  %v5990_v23 = vpack.c.bf16 %v1222_v24, %v1210_v26  ;;  %v7012_v55 = vand.u32 4294901760, %v5959_v16 }
  0xa8   : > { %4589 = vmatprep.subr.bf16.mxu0 %v5652_v14  ;;  %v5988_v56 = vpack.c.bf16 %v7008_v32, %v7007_v38  ;;  %v7013_v32 = vand.u32 4294901760, %v5948_v21  ;;  %v1245_v26 = vsub.f32 %v5969_v29, %v6885_v27  ;;  %v6897_v27 = vand.u32 4294901760, %v5994_v25 }
  0xa9   : > { %v5978_v40 = vsub.f32 %v5936_v58, %v7005_v34  ;;  %7010 = vst [vmem:[#allocation42_spill] sm:$0xff] %v5990_v23  ;;  %v5997_v34 = vpack.c.bf16 %v1228_v8, %v1216_v52  ;;  %v1233_v13 = vsub.f32 %v5959_v16, %v7012_v55  ;;  %4637 = vmatprep.subr.bf16.mxu1 %v5990_v23  ;;  %v7015_v8 = vand.u32 4294901760, %v5729_v47  ;;  %v6071_v16 = vld [vmem:[#allocation9 + $0xd0] sm:$0xff] }
  0xaa   : > { %7009 = vst [vmem:[#allocation41_spill] sm:$0xff] %v5988_v56  ;;  %4426 = vmatmul.mubr.f32.gmra.mrb[2].mxu0 %v5703_v35  ;;  %v6006_v24 = vsub.f32 %v5948_v21, %v7013_v32  ;;  %v6017_v55 = vsub.f32 %v5962_v63, %v6890_v4  ;;  %v7016_v35 = vand.u32 4294901760, %v5731_v48  ;;  %v1246_v4 = vand.u32 4294901760, %v1245_v26 }
  0xab   : > { %7006 = vst [vmem:[#allocation40_spill] sm:$0xff] %v5978_v40  ;;  %7011 = vst [vmem:[#allocation43_spill] sm:$0xff] %v5997_v34  ;;  %v6893_v18 = vand.u32 4294901760, %v5978_v40  ;;  %4432 = vmatprep.mubr.f32.mxu0 %v5648_v9  ;;  %4639 = vmatpush1.bf16.msra.mxu1 %v5997_v34  ;;  %v1234_v38 = vand.u32 4294901760, %v1233_v13  ;;  %v7017_v34 = vand.u32 4294901760, %v5980_v28  ;;  %v7018_v48 = vand.u32 4294901760, %v5982_v2 }
  0xac   : > { %7014 = vst [vmem:[#allocation44_spill] sm:$0xff] %v6006_v24  ;;  %v6894_v23 = vand.u32 4294901760, %v6006_v24  ;;  %v6030_v50 = vpack.c.bf16 %v7016_v35, %v7015_v8  ;;  %v6050_v26 = vsub.f32 %v5994_v25, %v6897_v27  ;;  %v6052_v8 = vld [vmem:[#allocation9 + $0xc0] sm:$0xff]  ;;  %v7023_v43 = vand.u32 4294901760, %v6017_v55 }
  0xad   : > { %v1239_v32 = vsub.f32 %v5978_v40, %v6893_v18  ;;  %v6036_v13 = vsub.f32 %v5980_v28, %v7017_v34  ;;  %v6045_v35 = vsub.f32 %v5982_v2, %v7018_v48  ;;  %v375_v34 = vld [vmem:[#allocation9 + $0xd8] sm:$0xff]  ;;  %v6062_v48 = vpack.c.bf16 %v1246_v4, %v1234_v38 }
  0xae   : > { %4433 = vmatmul.mubr.f32.vlgmr.msra.gmra.mrb[0].mxu0 %v5658_v17  ;;  %v1251_v47 = vsub.f32 %v6006_v24, %v6894_v23  ;;  %v7021_v23 = vand.u32 4294901760, %v5716_v42  ;;  %v1257_v27 = vsub.f32 %v6017_v55, %v7023_v43  ;;  %v1045_v43 = vand.u32 4294901760, %v375_v34 }
  0xaf   : > { %v1240_v18 = vand.u32 4294901760, %v1239_v32  ;;  %7019 = vst [vmem:[#allocation45_spill] sm:$0xff] %v6045_v35  ;;  %4435 = vmatprep.mubr.f32.mxu0 %v5663_v19  ;;  %4591 = vmatpush3.bf16.msra.mxu0 %v5652_v14  ;;  %v7020_v32 = vand.u32 4294901760, %v5707_v37  ;;  %7022 = vst [vmem:[#allocation46_spill] sm:$0xff] %v6062_v48  ;;  %v6906_v24 = vand.u32 4294901760, %v6036_v13  ;;  %v6910_v29 = vand.u32 4294901760, %v6045_v35 }
  0xb0   : > { %4593 = vmatprep.subr.bf16.mxu0 %v5988_v56  ;;  %v1252_v40 = vand.u32 4294901760, %v1251_v47  ;;  %v6913_v14 = vand.u32 4294901760, %v6050_v26  ;;  %v1041_v37 = vand.u32 4294901760, %v373_v39  ;;  %4641 = vmatprep.subr.bf16.mxu1 %v6062_v48  ;;  %v1258_v42 = vand.u32 4294901760, %v1257_v27 }
  0xb1   : > { %v6060_v52 = vpack.c.bf16 %v7021_v23, %v7020_v32  ;;  %v1269_v4 = vsub.f32 %v6036_v13, %v6906_v24  ;;  %v1263_v47 = vsub.f32 %v6045_v35, %v6910_v29  ;;  %v6092_v23 = vsub.f32 %v375_v34, %v1045_v43 }
  0xb2   : > { %4436 = vmatmul.mubr.f32.gmra.mrb[2].mxu0 %v5665_v20  ;;  %v6079_v38 = vpack.c.bf16 %v1252_v40, %v1240_v18  ;;  %v1275_v32 = vsub.f32 %v6050_v26, %v6913_v14  ;;  %v6087_v27 = vsub.f32 %v373_v39, %v1041_v37  ;;  %v6090_v48 = vpack.c.bf16 %v1045_v43, %v1041_v37 }
  0xb3   : > { %4442 = vmatprep.mubr.f32.mxu0 %v5648_v9  ;;  %v1270_v24 = vand.u32 4294901760, %v1269_v4  ;;  %v6915_v40 = vand.u32 4294901760, %v6071_v16  ;;  %v1264_v18 = vand.u32 4294901760, %v1263_v47  ;;  %v7025_v35 = vand.u32 4294901760, %v6052_v8  ;;  %v7069_v9 = vld [vmem:[#allocation40_spill] sm:$0xff] }
  0xb4   : > { %7024 = vst [vmem:[#allocation47_spill] sm:$0xff] %v6079_v38  ;;  %4643 = vmatpush1.bf16.msra.mxu1 %v6079_v38  ;;  %v1276_v56 = vand.u32 4294901760, %v1275_v32  ;;  %v6914_v29 = vand.u32 4294901760, %v6087_v27  ;;  %v6917_v37 = vand.u32 4294901760, %v6092_v23 }
  0xb5   : > { %v6100_v39 = vsub.f32 %v6052_v8, %v7025_v35  ;;  %v6102_v14 = vpack.c.bf16 %v1270_v24, %v1258_v42  ;;  %v6108_v34 = vsub.f32 %v6071_v16, %v6915_v40  ;;  %v7028_v24 = vand.u32 4294901760, %v5737_v53 }
  0xb6   : > { %4443 = vmatmul.mubr.f32.vlgmr.msra.gmra.mrb[0].mxu0 %v5658_v17  ;;  %v6111_v4 = vpack.c.bf16 %v1276_v56, %v1264_v18  ;;  %v1281_v43 = vsub.f32 %v6087_v27, %v6914_v29  ;;  %v7029_v42 = vand.u32 4294901760, %v5739_v54  ;;  %v1293_v56 = vsub.f32 %v6092_v23, %v6917_v37 }
  0xb7   : > { %7026 = vst [vmem:[#allocation48_spill] sm:$0xff] %v6102_v14  ;;  %v6916_v35 = vand.u32 4294901760, %v6100_v39  ;;  %4445 = vmatprep.mubr.f32.mxu0 %v5663_v19  ;;  %4595 = vmatpush1.bf16.msra.mxu0 %v6060_v52  ;;  %v6919_v32 = vand.u32 4294901760, %v6108_v34  ;;  %v7030_v18 = vand.u32 4294901760, %v5770_v3  ;;  %v7031_v29 = vand.u32 4294901760, %v5789_v12 }
  0xb8   : > { %7027 = vst [vmem:[#allocation49_spill] sm:$0xff] %v6111_v4  ;;  %v6123_v47 = vpack.c.bf16 %v7029_v42, %v7028_v24  ;;  %4597 = vmatprep.subr.bf16.mxu0 %v6030_v50  ;;  %4645 = vmatprep.subr.bf16.mxu1 %v6102_v14  ;;  %v1282_v53 = vand.u32 4294901760, %v1281_v43  ;;  %v1294_v24 = vand.u32 4294901760, %v1293_v56  ;;  %v7032_v12 = vand.u32 4294901760, %v5829_v31 }
  0xb9   : > { %v6133_v40 = vpack.c.bf16 %v7031_v29, %v7030_v18  ;;  %v1287_v54 = vsub.f32 %v6100_v39, %v6916_v35  ;;  %4647 = vmatpush1.bf16.msra.mxu1 %v6111_v4  ;;  %v1299_v3 = vsub.f32 %v6108_v34, %v6919_v32  ;;  %v7033_v43 = vand.u32 4294901760, %v5831_v5 }
  0xba   : > { %4446 = vmatmul.mubr.f32.gmra.mrb[2].mxu0 %v5665_v20  ;;  %v6152_v18 = vpack.c.bf16 %v1294_v24, %v1282_v53  ;;  %v7035_v56 = vand.u32 4294901760, %v5848_v51  ;;  %v7036_v37 = vand.u32 4294901760, %v5857_v1  ;;  %v7038_v5 = vand.u32 4294901760, %v5859_v33 }
  0xbb   : > { %v1288_v29 = vand.u32 4294901760, %v1287_v54  ;;  %4599 = vmatpush1.bf16.msra.mxu0 %v6123_v47  ;;  %v6150_v42 = vpack.c.bf16 %v7033_v43, %v7032_v12  ;;  %v1300_v35 = vand.u32 4294901760, %v1299_v3  ;;  %v7039_v31 = vand.u32 4294901760, %v5868_v49 }
  0xbc   : > { %7034 = vst [vmem:[#allocation50_spill] sm:$0xff] %v6152_v18  ;;  %v6158_v4 = vpack.c.bf16 %v7036_v37, %v7035_v56  ;;  %4601 = vmatprep.subr.bf16.mxu0 %v6133_v40  ;;  %4649 = vmatprep.subr.bf16.mxu1 %v6152_v18  ;;  %v7040_v51 = vand.u32 4294901760, %v5912_v7  ;;  %v7041_v1 = vand.u32 4294901760, %v5928_v22  ;;  %v7042_v33 = vand.u32 4294901760, %v5962_v63  ;;  %v377_v22 = vld [vmem:[#allocation9 + $0xe8] sm:$0xff]  ;;  %v376_v56 = vld [vmem:[#allocation9 + $0xe0] sm:$0xff] }
  0xbd   : > { %v6162_v54 = vpack.c.bf16 %v1300_v35, %v1288_v29  ;;  %v6169_v53 = vpack.c.bf16 %v7039_v31, %v7038_v5  ;;  %v7043_v49 = vand.u32 4294901760, %v5980_v28  ;;  %v7044_v24 = vand.u32 4294901760, %v5936_v58  ;;  %v379_v29 = vld [vmem:[#allocation9 + $0xf8] sm:$0xff]  ;;  %v378_v63 = vld [vmem:[#allocation9 + $0xf0] sm:$0xff] }
  0xbe   : > { %v6176_v37 = vpack.c.bf16 %v7041_v1, %v7040_v51  ;;  %v7045_v7 = vand.u32 4294901760, %v5948_v21  ;;  %v1049_v12 = vand.u32 4294901760, %v377_v22  ;;  %v1053_v43 = vand.u32 4294901760, %v379_v29 }
  0xbf   : > { %7037 = vst [vmem:[#allocation51_spill] sm:$0xff] %v6162_v54  ;;  %4603 = vmatpush1.bf16.msra.mxu0 %v6150_v42  ;;  %4651 = vmatpush1.bf16.msra.mxu1 %v6162_v54  ;;  %v6185_v35 = vpack.c.bf16 %v7043_v49, %v7042_v33  ;;  %v1051_v5 = vand.u32 4294901760, %v376_v56  ;;  %v1055_v28 = vand.u32 4294901760, %v378_v63 }
  0xc0   : > { %4605 = vmatprep.subr.bf16.mxu0 %v6158_v4  ;;  %v6191_v3 = vpack.c.bf16 %v7045_v7, %v7044_v24  ;;  %v6195_v31 = vsub.f32 %v377_v22, %v1049_v12  ;;  %v6197_v51 = vsub.f32 %v379_v29, %v1053_v43 }
  0xc1   : > { %v6199_v58 = vsub.f32 %v376_v56, %v1051_v5  ;;  %v6201_v21 = vsub.f32 %v378_v63, %v1055_v28 }
  0xc2   : > { %v6925_v1 = vand.u32 4294901760, %v6195_v31  ;;  %v6924_v33 = vand.u32 4294901760, %v6197_v51 }
  0xc3   : > { %4607 = vmatpush1.bf16.msra.mxu0 %v6169_v53  ;;  %v6929_v49 = vand.u32 4294901760, %v6199_v58  ;;  %v6928_v24 = vand.u32 4294901760, %v6201_v21 }
  0xc4   : > { %4609 = vmatprep.subr.bf16.mxu0 %v6176_v37  ;;  %v1305_v7 = vsub.f32 %v6195_v31, %v6925_v1  ;;  %v1317_v22 = vsub.f32 %v6197_v51, %v6924_v33  ;;  %v7048_v33 = vand.u32 4294901760, %v5982_v2  ;;  %v7049_v1 = vand.u32 4294901760, %v5994_v25 }
  0xc5   : > { %v1311_v29 = vsub.f32 %v6199_v58, %v6929_v49  ;;  %v1323_v56 = vsub.f32 %v6201_v21, %v6928_v24  ;;  %v7051_v2 = vand.u32 4294901760, %v6052_v8  ;;  %v7052_v25 = vand.u32 4294901760, %v6071_v16 }
  0xc6   : > { %v1306_v63 = vand.u32 4294901760, %v1305_v7  ;;  %v1318_v32 = vand.u32 4294901760, %v1317_v22  ;;  %v6228_v20 = vpack.c.bf16 %v7049_v1, %v7048_v33  ;;  %v6234_v7 = vpack.c.bf16 %v5727_v46, %v5714_v41 }
  0xc7   : > { %4611 = vmatpush1.bf16.msra.mxu0 %v6191_v3  ;;  %v1312_v54 = vand.u32 4294901760, %v1311_v29  ;;  %v1324_v18 = vand.u32 4294901760, %v1323_v56  ;;  %v6250_v1 = vpack.c.bf16 %v1055_v28, %v1051_v5  ;;  %v6255_v33 = vpack.c.bf16 %v6197_v51, %v6195_v31 }
  0xc8   : > { %4613 = vmatprep.subr.bf16.mxu0 %v6185_v35  ;;  %v6219_v14 = vpack.c.bf16 %v1318_v32, %v1306_v63  ;;  %7050 = vst [vmem:[#allocation54_spill] sm:$0xff] %v6234_v7  ;;  %v6930_v32 = vmov 0.0   ;;  %v6259_v16 = vpack.c.bf16 %v6201_v21, %v6199_v58  ;;  %v6265_v28 = vpack.c.bf16 %v5766_v0, %v5755_v60 }
  0xc9   : > { %v6221_v38 = vpack.c.bf16 %v1324_v18, %v1312_v54  ;;  %1358 = vmatprep.mubr.f32.mxu1 %v6930_v32  ;;  %v6243_v18 = vpack.c.bf16 %v7052_v25, %v7051_v2  ;;  %1089 = vmatprep.mubr.f32.mxu0 %v6930_v32  ;;  %v6246_v54 = vpack.c.bf16 %v1053_v43, %v1049_v12 }
  0xca   : > { %7046 = vst [vmem:[#allocation52_spill] sm:$0xff] %v6219_v14  ;;  %4653 = vmatprep.subr.bf16.mxu1 %v6219_v14  ;;  %7053 = vst [vmem:[#allocation55_spill] sm:$0xff] %v6255_v33  ;;  %v6271_v49 = vpack.c.bf16 %v5782_v10, %v5776_v6  ;;  %v6308_v14 = vpack.c.bf16 %v5884_v15, %v5879_v44 }
  0xcb   : > { %7047 = vst [vmem:[#allocation53_spill] sm:$0xff] %v6221_v38  ;;  %4655 = vmatpush1.bf16.msra.mxu1 %v6221_v38  ;;  %4615 = vmatpush1.bf16.msra.mxu0 %v6228_v20  ;;  %7054 = vst [vmem:[#allocation56_spill] sm:$0xff] %v6259_v16  ;;  %v6284_v38 = vpack.c.bf16 %v5800_v36, %v5787_v11 }
  0xcc   : > { %4617 = vmatprep.subr.bf16.mxu0 %v6090_v48  ;;  %4657 = vmatprep.subr.bf16.mxu1 %v6234_v7  ;;  %7056 = vst [vmem:[#allocation58_spill] sm:$0xff] %v6265_v28  ;;  %7057 = vst [vmem:[#allocation59_spill] sm:$0xff] %v6271_v49 }
  0xcd   : > { %7059 = vst [vmem:[#allocation60_spill] sm:$0xff] %v6284_v38  ;;  %7062 = vst [vmem:[#allocation63_spill] sm:$0xff] %v6308_v14 }
  0xcf   : > { %4619 = vmatpush1.bf16.msra.mxu0 %v6243_v18 }
  0xd0   : > { %4621 = vmatprep.subr.bf16.mxu0 %v6246_v54 }
  0xd3   : > { %4623 = vmatpush1.bf16.msra.mxu0 %v6250_v1 }
 0x161   : > { %v4394_v8 = vpop.f32.mrb[0].mxu1 }
 0x162   : > { %v470_v22 = vpop.f32.mrb[1].mxu1 }
 0x165   : > { %v4397_v12 = vpop.f32.mrb[2].mxu1 }
 0x166   : > { %v490_v43 = vpop.f32.mrb[3].mxu1 }
 0x189   : > { %v4444_v29 = vpop.f32.mrb[0].mxu0 }
 0x18a   : > { %v5024_v56 = vadd.f32 %v4444_v29, %v4394_v8  ;;  %v963_v63 = vpop.f32.mrb[1].mxu0 }
 0x18b   : > { %v5025_v2 = vadd.f32 %v963_v63, %v470_v22  ;;  %v7058_v63 = vmov 0.0  }
 0x18c   : > { %v6261_v5 = vand.u32 4294901760, %v5024_v56 }
 0x18d   : > { %v6267_v25 = vand.u32 4294901760, %v5025_v2  ;;  %v4447_v24 = vpop.f32.mrb[2].mxu0 }
 0x18e   : > { %7055 = vst [vmem:[#allocation57_spill] sm:$0xff] %v6261_v5  ;;  %v6274_v32 = vsub.f32 %v5024_v56, %v6261_v5  ;;  %v5026_v7 = vadd.f32 %v4447_v24, %v4397_v12  ;;  %v975_v8 = vpop.f32.mrb[3].mxu0  ;;  %v6288_v56 = vpack.c.bf16 %v5846_v57, %v5827_v30 }
 0x18f   : > { %v6277_v22 = vsub.f32 %v5025_v2, %v6267_v25  ;;  %v5027_v29 = vadd.f32 %v975_v8, %v490_v43  ;;  %1360 = vmatmul.mubr.f32.vlgmr.msra.gmra.mrb[4].mxu1 %v6267_v25  ;;  %v6312_v43 = vpack.c.bf16 %v5905_v45, %v5892_v59 }
 0x190   : > { %4659 = vmatpush1.bf16.msra.mxu1 %v6265_v28  ;;  %1365 = vmatprep.mubr.f32.mxu1 %v7058_v63  ;;  %7060 = vst [vmem:[#allocation61_spill] sm:$0xff] %v6288_v56  ;;  %v6291_v12 = vand.u32 4294901760, %v5026_v7 }
 0x191   : > { %v6937_v24 = vand.u32 4294901760, %v6277_v22  ;;  %v6293_v2 = vand.u32 4294901760, %v5027_v29  ;;  %4661 = vmatprep.subr.bf16.mxu1 %v6271_v49  ;;  %7063 = vst [vmem:[#allocation64_spill] sm:$0xff] %v6312_v43 }
 0x193   : > { %7061 = vst [vmem:[#allocation62_spill] sm:$0xff] %v6293_v2  ;;  %v1093_v8 = vsub.f32 %v6277_v22, %v6937_v24  ;;  %v6301_v28 = vsub.f32 %v5027_v29, %v6293_v2  ;;  %1367 = vmatmul.mubr.f32.gmra.mrb[6].mxu1 %v6261_v5  ;;  %v6315_v24 = vsub.f32 %v5026_v7, %v6291_v12  ;;  %v7064_v29 = vand.u32 4294901760, %v6274_v32 }
 0x194   : > { %4663 = vmatpush1.bf16.msra.mxu1 %v6284_v38  ;;  %1372 = vmatprep.mubr.f32.mxu1 %v7058_v63  ;;  %v6349_v5 = vpack.c.bf16 %v6036_v13, %v6017_v55 }
 0x195   : > { %v1094_v49 = vand.u32 4294901760, %v1093_v8  ;;  %4665 = vmatprep.subr.bf16.mxu1 %v6288_v56  ;;  %v1104_v38 = vsub.f32 %v6274_v32, %v7064_v29  ;;  %v6952_v19 = vand.u32 4294901760, %v6301_v28  ;;  %v6327_v8 = vpack.c.bf16 %v5926_v62, %v5910_v61  ;;  %v7066_v56 = vld [vmem:[#allocation38_spill] sm:$0xff]  ;;  %v7067_v29 = vld [vmem:[#allocation39_spill] sm:$0xff] }
 0x196   : > { %v6333_v17 = vpack.c.bf16 %v7067_v29, %v7066_v56  ;;  %7072 = vst [vmem:[#allocation40_spill] sm:$0xff] %v6349_v5 }
 0x197   : > { %1095 = vmatmul.mubr.f32.vlgmr.msra.gmra.mrb[4].mxu0 %v1094_v49  ;;  %1374 = vmatmul.mubr.f32.gmra.mrb[8].mxu1 %v6293_v2  ;;  %7065 = vst [vmem:[#allocation65_spill] sm:$0xff] %v6327_v8  ;;  %v1105_v7 = vand.u32 4294901760, %v1104_v38  ;;  %v1115_v49 = vsub.f32 %v6301_v28, %v6952_v19  ;;  %v7073_v19 = vld [vmem:[#allocation45_spill] sm:$0xff] }
 0x198   : > { %4667 = vmatpush1.bf16.msra.mxu1 %v6308_v14  ;;  %1100 = vmatprep.mubr.f32.mxu0 %v7058_v63  ;;  %7068 = vst [vmem:[#allocation38_spill] sm:$0xff] %v6333_v17  ;;  %v6955_v14 = vand.u32 4294901760, %v6315_v24 }
 0x199   : > { %1379 = vmatprep.mubr.f32.mxu1 %v7058_v63  ;;  %4669 = vmatprep.subr.bf16.mxu1 %v6312_v43  ;;  %v7070_v43 = vld [vmem:[#allocation44_spill] sm:$0xff]  ;;  %v1116_v2 = vand.u32 4294901760, %v1115_v49 }
 0x19a   : > { %v6344_v38 = vpack.c.bf16 %v7070_v43, %v7069_v9 }
 0x19b   : > { %1106 = vmatmul.mubr.f32.gmra.mrb[6].mxu0 %v1105_v7  ;;  %1381 = vmatmul.mubr.f32.gmra.mrb[10].mxu1 %v6291_v12  ;;  %v1126_v7 = vsub.f32 %v6315_v24, %v6955_v14  ;;  %v7077_v14 = vld [vmem:[#allocation28_spill] sm:$0xff] }
 0x19c   : > { %4671 = vmatpush1.bf16.msra.mxu1 %v6327_v8  ;;  %1111 = vmatprep.mubr.f32.mxu0 %v7058_v63  ;;  %7071 = vst [vmem:[#allocation39_spill] sm:$0xff] %v6344_v38  ;;  %v6359_v8 = vpack.c.bf16 %v6050_v26, %v7073_v19 }
 0x19d   : > { %4673 = vmatprep.subr.bf16.mxu1 %v6333_v17  ;;  %1515 = vmatprep.mubr.f32.mxu1 %v7058_v63  ;;  %v1127_v49 = vand.u32 4294901760, %v1126_v7  ;;  %v6364_v17 = vpack.c.bf16 %v6092_v23, %v6087_v27  ;;  %v7078_v7 = vld [vmem:[#allocation41_spill] sm:$0xff] }
 0x19e   : > { %7074 = vst [vmem:[#allocation44_spill] sm:$0xff] %v6359_v8 }
 0x19f   : > { %1117 = vmatmul.mubr.f32.gmra.mrb[8].mxu0 %v1116_v2  ;;  %7075 = vst [vmem:[#allocation45_spill] sm:$0xff] %v6364_v17  ;;  %v6369_v2 = vpack.c.bf16 %v6108_v34, %v6100_v39 }
 0x1a0   : > { %4675 = vmatpush1.bf16.msra.mxu1 %v6344_v38  ;;  %1122 = vmatprep.mubr.f32.mxu0 %v7058_v63  ;;  %v7084_v38 = vand.u32 4294901760, %v5782_v10 }
 0x1a1   : > { %4677 = vmatprep.subr.bf16.mxu1 %v6349_v5  ;;  %7076 = vst [vmem:[#allocation66_spill] sm:$0xff] %v6369_v2  ;;  %v7083_v5 = vand.u32 4294901760, %v5776_v6  ;;  %v7089_v6 = vand.u32 4294901760, %v5846_v57  ;;  %v7094_v57 = vand.u32 4294901760, %v5905_v45  ;;  %v7099_v45 = vand.u32 4294901760, %v7067_v29 }
 0x1a2   : > { %v7104_v29 = vand.u32 4294901760, %v6036_v13  ;;  %v7110_v13 = vand.u32 4294901760, %v6108_v34  ;;  %v7116_v34 = vld [vmem:[#allocation62_spill] sm:$0xff] }
 0x1a3   : > { %1128 = vmatmul.mubr.f32.gmra.mrb[10].mxu0 %v1127_v49  ;;  %v7079_v49 = vand.u32 4294901760, %v5714_v41  ;;  %v7085_v41 = vand.u32 4294901760, %v6277_v22 }
 0x1a4   : > { %4679 = vmatpush1.bf16.msra.mxu1 %v6359_v8  ;;  %4452 = vmatprep.mubr.f32.mxu0 %v7077_v14  ;;  %v6417_v14 = vpack.c.bf16 %v7084_v38, %v7083_v5 }
 0x1a5   : > { %4681 = vmatprep.subr.bf16.mxu1 %v6364_v17  ;;  %v7082_v17 = vand.u32 4294901760, %v5766_v0  ;;  %v7088_v0 = vand.u32 4294901760, %v5827_v30  ;;  %v7093_v30 = vand.u32 4294901760, %v5892_v59  ;;  %v7098_v59 = vand.u32 4294901760, %v7066_v56 }
 0x1a6   : > { %v7103_v56 = vand.u32 4294901760, %v6017_v55  ;;  %v7109_v55 = vand.u32 4294901760, %v6100_v39  ;;  %v7115_v39 = vld [vmem:[#allocation57_spill] sm:$0xff] }
 0x1a7   : > { %v6434_v10 = vpack.c.bf16 %v7089_v6, %v7088_v0 }
 0x1a8   : > { %4683 = vmatpush1.bf16.msra.mxu1 %v6369_v2  ;;  %v7081_v2 = vand.u32 4294901760, %v5755_v60  ;;  %v6506_v6 = vpack.c.bf16 %v7110_v13, %v7109_v55  ;;  %v380_v55 = vld [vmem:[%s6822_s3] sm:$0xff] }
 0x1a9   : > { %4685 = vmatprep.subr.bf16.mxu1 %v6255_v33 }
 0x1aa   : > { %v6410_v8 = vpack.c.bf16 %v7082_v17, %v7081_v2  ;;  %v7087_v17 = vand.u32 4294901760, %v5800_v36  ;;  %v7092_v36 = vand.u32 4294901760, %v5884_v15  ;;  %v7097_v15 = vand.u32 4294901760, %v5926_v62 }
 0x1ab   : > { %v6468_v2 = vpack.c.bf16 %v7099_v45, %v7098_v59 }
 0x1ac   : > { %4687 = vmatpush1.bf16.msra.mxu1 %v6259_v16  ;;  %v7080_v16 = vand.u32 4294901760, %v5727_v46  ;;  %v7086_v46 = vand.u32 4294901760, %v5787_v11  ;;  %v7091_v11 = vand.u32 4294901760, %v5879_v44  ;;  %v7096_v44 = vand.u32 4294901760, %v5910_v61 }
 0x1ad   : > { %4689 = vmatprep.subr.bf16.mxu1 %v7078_v7  ;;  %v7102_v61 = vand.u32 4294901760, %v7070_v43  ;;  %v7107_v43 = vand.u32 4294901760, %v6087_v27  ;;  %v7114_v27 = vand.u32 4294901760, %v6201_v21 }
 0x1ae   : > { %v6403_v33 = vpack.c.bf16 %v7080_v16, %v7079_v49  ;;  %v6427_v60 = vpack.c.bf16 %v7087_v17, %v7086_v46  ;;  %v7090_v16 = vand.u32 4294901760, %v6274_v32  ;;  %v6444_v5 = vpack.c.bf16 %v7092_v36, %v7091_v11 }
 0x1af   : > { %1518 = vmatmul.mubr.f32.vlgmr.msra.gmra.mrb[4].mxu1 %v6277_v22  ;;  %v6451_v22 = vpack.c.bf16 %v7094_v57, %v7093_v30  ;;  %v6461_v38 = vpack.c.bf16 %v7097_v15, %v7096_v44  ;;  %v7101_v49 = vand.u32 4294901760, %v7069_v9  ;;  %v7106_v9 = vand.u32 4294901760, %v6050_v26 }
 0x1b0   : > { %4691 = vmatpush1.bf16.msra.mxu1 %v6060_v52  ;;  %1523 = vmatprep.mubr.f32.mxu1 %v7058_v63  ;;  %v7108_v17 = vand.u32 4294901760, %v6092_v23  ;;  %v7112_v26 = vand.u32 4294901760, %v6197_v51  ;;  %v7113_v23 = vand.u32 4294901760, %v6199_v58 }
 0x1b1   : > { %4693 = vmatprep.subr.bf16.mxu1 %v6030_v50  ;;  %v6477_v62 = vpack.c.bf16 %v7102_v61, %v7101_v49 }
 0x1b2   : > { %v6499_v0 = vpack.c.bf16 %v7108_v17, %v7107_v43  ;;  %v6520_v11 = vpack.c.bf16 %v7114_v27, %v7113_v23  ;;  %v1999_v17 = vld [vmem:[%s287_s16] sm:$0xff] }
 0x1b3   : > { %1526 = vmatmul.mubr.f32.gmra.mrb[6].mxu1 %v6274_v32  ;;  %v7095_v32 = vand.u32 4294901760, %v6301_v28 }
 0x1b4   : > { %4695 = vmatpush1.bf16.msra.mxu1 %v6123_v47  ;;  %1531 = vmatprep.mubr.f32.mxu1 %v7058_v63 }
 0x1b5   : > { %4697 = vmatprep.subr.bf16.mxu1 %v6133_v40 }
 0x1b7   : > { %1534 = vmatmul.mubr.f32.gmra.mrb[8].mxu1 %v6301_v28  ;;  %v7100_v28 = vand.u32 4294901760, %v6315_v24 }
 0x1b8   : > { %4699 = vmatpush1.bf16.msra.mxu1 %v6150_v42  ;;  %1539 = vmatprep.mubr.f32.mxu1 %v7058_v63 }
 0x1b9   : > { %4701 = vmatprep.subr.bf16.mxu1 %v6158_v4 }
 0x1bb   : > { %1542 = vmatmul.mubr.f32.gmra.mrb[10].mxu1 %v6315_v24  ;;  %v7105_v24 = vand.u32 4294901760, %v7073_v19  ;;  %v7111_v19 = vand.u32 4294901760, %v6195_v31  ;;  %v7117_v31 = vld [vmem:[#allocation32_spill] sm:$0xff] }
 0x1bc   : > { %4703 = vmatpush1.bf16.msra.mxu1 %v6169_v53  ;;  %1644 = vmatprep.mubr.f32.mxu1 %v7058_v63 }
 0x1bd   : > { %4705 = vmatprep.subr.bf16.mxu1 %v6176_v37  ;;  %v6492_v46 = vpack.c.bf16 %v7106_v9, %v7105_v24  ;;  %v2007_v24 = vld [vmem:[%s296_s26] sm:$0xff] }
 0x1c0   : > { %4707 = vmatpush1.bf16.msra.mxu1 %v6191_v3 }
 0x1c1   : > { %4709 = vmatprep.subr.bf16.mxu1 %v6185_v35 }
 0x1c4   : > { %4711 = vmatpush1.bf16.msra.mxu1 %v6228_v20 }
 0x1c5   : > { %4713 = vmatprep.subr.bf16.mxu1 %v6090_v48 }
 0x1c8   : > { %4715 = vmatpush1.bf16.msra.mxu1 %v6243_v18 }
 0x1c9   : > { %4717 = vmatprep.subr.bf16.mxu1 %v6246_v54 }
 0x1cc   : > { %4719 = vmatpush1.bf16.msra.mxu1 %v6250_v1 }
 0x1cd   : > { %4721 = vmatprep.subr.bf16.mxu1 %v6403_v33 }
 0x1cf   : > { %1648 = vmatmul.mubr.f32.vlgmr.msra.gmra.mrb[4].mxu1 %v7085_v41  ;;  %v6485_v41 = vpack.c.bf16 %v7104_v29, %v7103_v56 }
 0x1d0   : > { %4723 = vmatpush1.bf16.msra.mxu1 %v6410_v8  ;;  %1653 = vmatprep.mubr.f32.mxu1 %v7058_v63 }
 0x1d1   : > { %4725 = vmatprep.subr.bf16.mxu1 %v6417_v14 }
 0x1d3   : > { %1657 = vmatmul.mubr.f32.gmra.mrb[6].mxu1 %v7090_v16  ;;  %v6513_v16 = vpack.c.bf16 %v7112_v26, %v7111_v19 }
 0x1d4   : > { %4727 = vmatpush1.bf16.msra.mxu1 %v6427_v60  ;;  %1662 = vmatprep.mubr.f32.mxu1 %v7058_v63 }
 0x1d5   : > { %4729 = vmatprep.subr.bf16.mxu1 %v6434_v10 }
 0x1d7   : > { %1666 = vmatmul.mubr.f32.gmra.mrb[8].mxu1 %v7095_v32 }
 0x1d8   : > { %4731 = vmatpush1.bf16.msra.mxu1 %v6444_v5  ;;  %1671 = vmatprep.mubr.f32.mxu1 %v7058_v63 }
 0x1d9   : > { %4733 = vmatprep.subr.bf16.mxu1 %v6451_v22 }
 0x1db   : > { %1675 = vmatmul.mubr.f32.gmra.mrb[10].mxu1 %v7100_v28 }
 0x1dc   : > { %4735 = vmatpush1.bf16.msra.mxu1 %v6461_v38  ;;  %1841 = vmatprep.mubr.f32.mxu1 %v7058_v63 }
 0x1dd   : > { %4737 = vmatprep.subr.bf16.mxu1 %v6468_v2 }
 0x1e0   : > { %4739 = vmatpush1.bf16.msra.mxu1 %v6477_v62 }
 0x1e1   : > { %4741 = vmatprep.subr.bf16.mxu1 %v6485_v41 }
 0x1e4   : > { %4743 = vmatpush1.bf16.msra.mxu1 %v6492_v46 }
 0x1e5   : > { %4745 = vmatprep.subr.bf16.mxu1 %v6499_v0 }
 0x1e8   : > { %4747 = vmatpush1.bf16.msra.mxu1 %v6506_v6 }
 0x1e9   : > { %4749 = vmatprep.subr.bf16.mxu1 %v6513_v16 }
 0x1ec   : > { %4751 = vmatpush1.bf16.msra.mxu1 %v6520_v11 }
 0x1ed   : > { %4753 = vmatprep.subr.bf16.mxu1 %v7078_v7 }
 0x1ef   : > { %1843 = vmatmul.mubr.f32.vlgmr.msra.gmra.mrb[4].mxu1 %v6267_v25 }
 0x1f0   : > { %4755 = vmatpush1.bf16.msra.mxu1 %v6060_v52  ;;  %1848 = vmatprep.mubr.f32.mxu1 %v7058_v63 }
 0x1f1   : > { %4757 = vmatprep.subr.bf16.mxu1 %v6030_v50 }
 0x1f3   : > { %1850 = vmatmul.mubr.f32.gmra.mrb[6].mxu1 %v7115_v39 }
 0x1f4   : > { %4759 = vmatpush1.bf16.msra.mxu1 %v6123_v47  ;;  %1855 = vmatprep.mubr.f32.mxu1 %v7058_v63 }
 0x1f5   : > { %4761 = vmatprep.subr.bf16.mxu1 %v6133_v40 }
 0x1f7   : > { %1857 = vmatmul.mubr.f32.gmra.mrb[8].mxu1 %v7116_v34 }
 0x1f8   : > { %4763 = vmatpush1.bf16.msra.mxu1 %v6150_v42  ;;  %1862 = vmatprep.mubr.f32.mxu1 %v7058_v63 }
 0x1f9   : > { %4765 = vmatprep.subr.bf16.mxu1 %v6158_v4 }
 0x1fb   : > { %1864 = vmatmul.mubr.f32.gmra.mrb[10].mxu1 %v6291_v12 }
 0x1fc   : > { %4767 = vmatpush1.bf16.msra.mxu1 %v6169_v53  ;;  %1966 = vmatprep.mubr.f32.mxu1 %v7058_v63 }
 0x1fd   : > { %4769 = vmatprep.subr.bf16.mxu1 %v6176_v37 }
 0x200   : > { %4771 = vmatpush1.bf16.msra.mxu1 %v6191_v3 }
 0x201   : > { %4773 = vmatprep.subr.bf16.mxu1 %v6185_v35 }
 0x204   : > { %4775 = vmatpush1.bf16.msra.mxu1 %v6228_v20 }
 0x205   : > { %4777 = vmatprep.subr.bf16.mxu1 %v6090_v48 }
 0x208   : > { %4779 = vmatpush1.bf16.msra.mxu1 %v6243_v18 }
 0x209   : > { %4781 = vmatprep.subr.bf16.mxu1 %v6246_v54 }
 0x20c   : > { %4783 = vmatpush1.bf16.msra.mxu1 %v6250_v1 }
 0x20d   : > { %4833 = vmatprep.subr.bf16.mxu1 %v7078_v7 }
 0x20f   : > { %1968 = vmatmul.mubr.f32.vlgmr.msra.gmra.mrb[4].mxu1 %v6267_v25 }
 0x210   : > { %1973 = vmatprep.mubr.f32.mxu1 %v7058_v63 }
 0x213   : > { %1975 = vmatmul.mubr.f32.gmra.mrb[6].mxu1 %v7115_v39 }
 0x214   : > { %1980 = vmatprep.mubr.f32.mxu1 %v7058_v63 }
 0x215   : > { %4835 = vmatpush1.bf16.xpose.msra.mxu1 %v6060_v52 }
 0x216   : > { %4837 = vmatprep.subr.bf16.mxu1 %v6030_v50 }
 0x217   : > { %1982 = vmatmul.mubr.f32.gmra.mrb[8].mxu1 %v7116_v34  ;;  %v2008_v34 = vld [vmem:[%s296_s26 + $0x8] sm:$0xff] }
 0x218   : > { %1987 = vmatprep.mubr.f32.mxu1 %v7058_v63 }
 0x21b   : > { %1989 = vmatmul.mubr.f32.gmra.mrb[10].mxu1 %v6291_v12 }
 0x21d   : > { %4839 = vmatpush1.bf16.xpose.msra.mxu1 %v6123_v47 }
 0x21e   : > { %4841 = vmatprep.subr.bf16.mxu1 %v6133_v40 }
 0x225   : > { %4843 = vmatpush1.bf16.xpose.msra.mxu1 %v6150_v42 }
 0x226   : > { %4845 = vmatprep.subr.bf16.mxu1 %v6158_v4 }
 0x22d   : > { %4847 = vmatpush1.bf16.xpose.msra.mxu1 %v6169_v53 }
 0x22e   : > { %4849 = vmatprep.subr.bf16.mxu1 %v6176_v37 }
 0x235   : > { %4851 = vmatpush1.bf16.xpose.msra.mxu1 %v6191_v3 }
 0x236   : > { %4853 = vmatprep.subr.bf16.mxu1 %v6185_v35 }
 0x23d   : > { %4855 = vmatpush1.bf16.xpose.msra.mxu1 %v6228_v20 }
 0x23e   : > { %4857 = vmatprep.subr.bf16.mxu1 %v6090_v48 }
 0x245   : > { %4859 = vmatpush1.bf16.xpose.msra.mxu1 %v6243_v18 }
 0x246   : > { %4861 = vmatprep.subr.bf16.mxu1 %v6246_v54 }
 0x24d   : > { %4863 = vmatpush1.bf16.xpose.msra.mxu1 %v6250_v1 }
 0x24e   : > { %4865 = vmatprep.subr.bf16.mxu1 %v7117_v31 }
 0x26a   : > { %v1096_v51 = vpop.f32.mrb[4].mxu0 }
 0x26b   : > { %v1098_v58 = vpop.f32.mrb[5].mxu0 }
 0x26e   : > { %v1107_v21 = vpop.f32.mrb[6].mxu0 }
 0x26f   : > { %v1109_v25 = vpop.f32.mrb[7].mxu0 }
 0x272   : > { %v1118_v63 = vpop.f32.mrb[8].mxu0 }
 0x273   : > { %v1120_v12 = vpop.f32.mrb[9].mxu0 }
 0x276   : > { %v1129_v36 = vpop.f32.mrb[10].mxu0 }
 0x277   : > { %v1131_v30 = vpop.f32.mrb[11].mxu0 }
 0x2e2   : > { %v1969_v57 = vpop.f32.mrb[4].mxu1 }
 0x2e3   : > { %v5028_v32 = vadd.f32 %v1969_v57, %v1096_v51  ;;  %v1971_v44 = vpop.f32.mrb[5].mxu1 }
 0x2e4   : > { %v5029_v15 = vadd.f32 %v1971_v44, %v1098_v58 }
 0x2e6   : > { %v1976_v59 = vpop.f32.mrb[6].mxu1 }
 0x2e7   : > { %v5030_v45 = vadd.f32 %v1976_v59, %v1107_v21  ;;  %v1978_v28 = vpop.f32.mrb[7].mxu1  ;;  %v2000_v21 = vld [vmem:[%s287_s16 + $0x8] sm:$0xff]  ;;  %s338_s16 = scalar_lea.vmem [#allocation10], %s5613_s7  ;;  %s4124_s7 = scalar_lea.sflag [#allocation6], %s5610_s13 }
 0x2e8   : > { %v5031_v49 = vadd.f32 %v1978_v28, %v1109_v25  ;;  %s4137_s26 = sshll.u32 %s338_s16, 4  ;;  %s6770_s26 = int_to_ptr.vmem [resolvable:$true] %s4137_s26 }
 0x2e9   : > { %s5301_s1 = scalar_lea.vmem %s6770_s26, 256  ;;  %p5308_p5 = scmp.lt.s32.totalorder %s6770_s26, %s5306_s17 }
 0x2ea   : > { %v1983_v61 = vpop.f32.mrb[8].mxu1  ;;  %p5302_p7 = scmp.ne.s32.totalorder %s6770_s26, %s5301_s1  ;;  %p5309_p2 = scmp.lt.s32.totalorder %s5307_s15, %s5301_s1 }
 0x2eb   : > { %v5032_v56 = vadd.f32 %v1983_v61, %v1118_v63  ;;  %v1985_v29 = vpop.f32.mrb[9].mxu1  ;;  %v381_v63 = vld [vmem:[%s6822_s3 + $0x8] sm:$0xff] }
 0x2ec   : > { %v5033_v9 = vadd.f32 %v1985_v29, %v1120_v12  ;;  %p5303_p9 = pnand %p5302_p7, %p5514_p12  ;;  %p5310_p6 = por %p5309_p2, %p5308_p5 }
 0x2ed   : > { %v1997_v43 = vadd.f32 %v5032_v56, %v5029_v15 }
 0x2ee   : > { %v1995_v13 = vsub.f32 %v5028_v32, %v5033_v9  ;;  %v1990_v19 = vpop.f32.mrb[10].mxu1  ;;  %p5304_p1 = pneg %p5303_p9 }
 0x2ef   : > { %v2009_v26 = vsub.f32 %v2007_v24, %v1997_v43  ;;  %v5034_v23 = vadd.f32 %v1990_v19, %v1129_v36  ;;  %v1992_v27 = vpop.f32.mrb[11].mxu1 }
 0x2f0   : > { %v2001_v39 = vsub.f32 %v1999_v17, %v1995_v13  ;;  %v5035_v31 = vadd.f32 %v1992_v27, %v1131_v30  ;;  %p5311_p8 = pnand %p5310_p6, %p5304_p1 }
 0x2f1   : > { %v2011_v51 = vmul.f32 %v2009_v26, %v380_v55  ;;  %v1998_v58 = vadd.f32 %v5034_v23, %v5031_v49 }
 0x2f2   : > { %v2003_v25 = vmul.f32 %v2001_v39, %v380_v55  ;;  %v1996_v12 = vsub.f32 %v5030_v45, %v5035_v31 }
 0x2f3   : > { %v2013_v57 = vadd.f32 %v2011_v51, %v1997_v43  ;;  %v2010_v32 = vsub.f32 %v2008_v34, %v1998_v58 }
 0x2f4   : > { %v2005_v44 = vadd.f32 %v2003_v25, %v1995_v13  ;;  %v2002_v15 = vsub.f32 %v2000_v21, %v1996_v12 }
 0x2f5   : > { %v2604_v36 = vand.u32 4294901760, %v2013_v57  ;;  %v2012_v59 = vmul.f32 %v2010_v32, %v381_v63 }
 0x2f6   : > { %v2016_v28 = vand.u32 4294901760, %v2005_v44  ;;  %v2004_v61 = vmul.f32 %v2002_v15, %v381_v63  ;;  %v7119_v15 = vld [vmem:[#allocation30_spill] sm:$0xff] }
 0x2f7   : > { %v2712_v56 = vsub.f32 %v2013_v57, %v2604_v36  ;;  %v2014_v30 = vadd.f32 %v2012_v59, %v1998_v58  ;;  %v7118_v57 = vld [vmem:[#allocation29_spill] sm:$0xff] }
 0x2f8   : > { %v2124_v29 = vsub.f32 %v2005_v44, %v2016_v28  ;;  %v2006_v49 = vadd.f32 %v2004_v61, %v1996_v12  ;;  %v7121_v61 = vld [vmem:[#allocation16_spill] sm:$0xff] }
 0x2f9   : > { %v2607_v24 = vand.u32 4294901760, %v2014_v30  ;;  %v2713_v9 = vand.u32 4294901760, %v2712_v56 }
 0x2fa   : > { %v2019_v17 = vand.u32 4294901760, %v2006_v49  ;;  %v2125_v55 = vand.u32 4294901760, %v2124_v29 }
 0x2fb   : > { %v6586_v19 = vpack.c.bf16 %v2607_v24, %v2604_v36  ;;  %v2719_v26 = vsub.f32 %v2014_v30, %v2607_v24  ;;  %v2714_v23 = vsub.f32 %v2712_v56, %v2713_v9  ;;  %v7123_v30 = vld [vmem:[#allocation18_spill] sm:$0xff]  ;;  %v7126_v24 = vld [vmem:[#allocation21_spill] sm:$0xff] }
 0x2fc   : > { %v4784_v45 = vpack.c.bf16 %v2019_v17, %v2016_v28  ;;  %v2131_v43 = vsub.f32 %v2006_v49, %v2019_v17  ;;  %v2126_v39 = vsub.f32 %v2124_v29, %v2125_v55  ;;  %v7120_v28 = vld [vmem:[#allocation31_spill] sm:$0xff]  ;;  %v7125_v49 = vld [vmem:[#allocation20_spill] sm:$0xff] }
 0x2fd   : > { %v2720_v13 = vand.u32 4294901760, %v2719_v26  ;;  %v4816_v27 = vpack.c.bf16 %v2719_v26, %v2712_v56  ;;  %v2715_v63 = vand.u32 4294901760, %v2714_v23  ;;  %v7122_v56 = vld [vmem:[#allocation17_spill] sm:$0xff]  ;;  %v7128_v17 = vld [vmem:[#allocation23_spill] sm:$0xff] }
 0x2fe   : > { %4785 = vmatprep.subr.bf16.mxu0 %v4784_v45  ;;  %v2132_v34 = vand.u32 4294901760, %v2131_v43  ;;  %v4792_v31 = vpack.c.bf16 %v2131_v43, %v2124_v29  ;;  %v2127_v32 = vand.u32 4294901760, %v2126_v39  ;;  %v7124_v29 = vld [vmem:[#allocation19_spill] sm:$0xff] }
 0x2ff   : > { %4787 = vmatpush3.bf16.msra.mxu0 %v4784_v45  ;;  %v2721_v51 = vsub.f32 %v2719_v26, %v2720_v13  ;;  %v6588_v58 = vpack.c.bf16 %v2720_v13, %v2713_v9  ;;  %v7127_v9 = vld [vmem:[#allocation22_spill] sm:$0xff]  ;;  %v7130_v26 = vld [vmem:[#allocation25_spill] sm:$0xff]  ;;  %v7132_v23 = vld [vmem:[#allocation27_spill] sm:$0xff] }
 0x300   : > { %v2133_v21 = vsub.f32 %v2131_v43, %v2132_v34  ;;  %v4800_v25 = vpack.c.bf16 %v2132_v34, %v2125_v55  ;;  %v7129_v55 = vld [vmem:[#allocation24_spill] sm:$0xff]  ;;  %v7131_v43 = vld [vmem:[#allocation26_spill] sm:$0xff] }
 0x301   : > { %v2722_v12 = vand.u32 4294901760, %v2721_v51  ;;  %v7133_v13 = vld [vmem:[#allocation28_spill] sm:$0xff] }
 0x302   : > { %4453 = vmatmul.mubr.f32.vlgmr.msra.gmra.mrb[12].mxu0 %v7118_v57  ;;  %v2134_v44 = vand.u32 4294901760, %v2133_v21 }
 0x303   : > { %4455 = vmatprep.mubr.f32.mxu0 %v7119_v15  ;;  %v4812_v36 = vpack.c.bf16 %v2722_v12, %v2715_v63 }
 0x304   : > { %v4788_v59 = vpack.c.bf16 %v2134_v44, %v2127_v32 }
 0x306   : > { %4456 = vmatmul.mubr.f32.gmra.mrb[14].mxu0 %v7120_v28  ;;  %4789 = vmatprep.subr.bf16.mxu0 %v4788_v59 }
 0x307   : > { %4791 = vmatpush3.bf16.msra.mxu0 %v4788_v59  ;;  %4462 = vmatprep.mubr.f32.mxu0 %v7121_v61 }
 0x308   : > { %4793 = vmatprep.subr.bf16.mxu0 %v4792_v31 }
 0x30a   : > { %4463 = vmatmul.mubr.f32.vlgmr.msra.gmra.mrb[12].mxu0 %v7122_v56 }
 0x30b   : > { %4795 = vmatpush3.bf16.msra.mxu0 %v4792_v31  ;;  %4465 = vmatprep.mubr.f32.mxu0 %v7123_v30 }
 0x30c   : > { %4797 = vmatprep.subr.bf16.mxu0 %v4784_v45 }
 0x30e   : > { %4466 = vmatmul.mubr.f32.gmra.mrb[14].mxu0 %v7124_v29 }
 0x30f   : > { %4472 = vmatprep.mubr.f32.mxu0 %v7125_v49 }
 0x312   : > { %4473 = vmatmul.mubr.f32.vlgmr.msra.gmra.mrb[12].mxu0 %v7126_v24 }
 0x313   : > { %4799 = vmatpush3.bf16.msra.mxu0 %v4784_v45  ;;  %4475 = vmatprep.mubr.f32.mxu0 %v7127_v9 }
 0x314   : > { %4801 = vmatprep.subr.bf16.mxu0 %v4800_v25 }
 0x316   : > { %4476 = vmatmul.mubr.f32.gmra.mrb[14].mxu0 %v7128_v17 }
 0x317   : > { %4482 = vmatprep.mubr.f32.mxu0 %v7129_v55 }
 0x31a   : > { %4483 = vmatmul.mubr.f32.vlgmr.msra.gmra.mrb[12].mxu0 %v7130_v26 }
 0x31b   : > { %4803 = vmatpush3.bf16.msra.mxu0 %v4800_v25  ;;  %4485 = vmatprep.mubr.f32.mxu0 %v7131_v43 }
 0x31c   : > { %4805 = vmatprep.subr.bf16.mxu0 %v4784_v45 }
 0x31e   : > { %4486 = vmatmul.mubr.f32.gmra.mrb[14].mxu0 %v7132_v23 }
 0x31f   : > { %4492 = vmatprep.mubr.f32.mxu0 %v7121_v61 }
 0x322   : > { %4493 = vmatmul.mubr.f32.vlgmr.msra.gmra.mrb[12].mxu0 %v7122_v56 }
 0x323   : > { %4807 = vmatpush3.bf16.msra.mxu0 %v4784_v45  ;;  %4495 = vmatprep.mubr.f32.mxu0 %v7123_v30 }
 0x324   : > { %4809 = vmatprep.subr.bf16.mxu0 %v6586_v19 }
 0x326   : > { %4496 = vmatmul.mubr.f32.gmra.mrb[14].mxu0 %v7124_v29 }
 0x327   : > { %4502 = vmatprep.mubr.f32.mxu0 %v7121_v61 }
 0x32a   : > { %4503 = vmatmul.mubr.f32.vlgmr.msra.gmra.mrb[12].mxu0 %v7122_v56 }
 0x32b   : > { %4811 = vmatpush3.bf16.msra.mxu0 %v6586_v19  ;;  %4505 = vmatprep.mubr.f32.mxu0 %v7123_v30 }
 0x32c   : > { %4813 = vmatprep.subr.bf16.mxu0 %v4812_v36 }
 0x32e   : > { %4506 = vmatmul.mubr.f32.gmra.mrb[14].mxu0 %v7124_v29 }
 0x32f   : > { %4512 = vmatprep.mubr.f32.mxu0 %v7133_v13  ;;  %v7141_v13 = vld [vmem:[#allocation46_spill] sm:$0xff] }
 0x332   : > { %4513 = vmatmul.mubr.f32.vlgmr.msra.gmra.mrb[16].mxu0 %v7118_v57 }
 0x333   : > { %4815 = vmatpush3.bf16.msra.mxu0 %v4812_v36  ;;  %4515 = vmatprep.mubr.f32.mxu0 %v7119_v15 }
 0x334   : > { %4817 = vmatprep.subr.bf16.mxu0 %v4816_v27 }
 0x336   : > { %4516 = vmatmul.mubr.f32.gmra.mrb[12].mxu0 %v7120_v28 }
 0x337   : > { %4522 = vmatprep.mubr.f32.mxu0 %v7121_v61 }
 0x33a   : > { %4523 = vmatmul.mubr.f32.vlgmr.msra.gmra.mrb[16].mxu0 %v7122_v56 }
 0x33b   : > { %4819 = vmatpush3.bf16.msra.mxu0 %v4816_v27  ;;  %4525 = vmatprep.mubr.f32.mxu0 %v7123_v30 }
 0x33c   : > { %4821 = vmatprep.subr.bf16.mxu0 %v6586_v19 }
 0x33e   : > { %4526 = vmatmul.mubr.f32.gmra.mrb[12].mxu0 %v7124_v29 }
 0x33f   : > { %4532 = vmatprep.mubr.f32.mxu0 %v7125_v49 }
 0x342   : > { %4533 = vmatmul.mubr.f32.vlgmr.msra.gmra.mrb[16].mxu0 %v7126_v24 }
 0x343   : > { %4823 = vmatpush3.bf16.msra.mxu0 %v6586_v19  ;;  %4535 = vmatprep.mubr.f32.mxu0 %v7127_v9 }
 0x344   : > { %4825 = vmatprep.subr.bf16.mxu0 %v6588_v58 }
 0x346   : > { %4536 = vmatmul.mubr.f32.gmra.mrb[12].mxu0 %v7128_v17  ;;  %v7134_v17 = vld [vmem:[#allocation33_spill] sm:$0xff] }
 0x347   : > { %4542 = vmatprep.mubr.f32.mxu0 %v7129_v55 }
 0x34a   : > { %4543 = vmatmul.mubr.f32.vlgmr.msra.gmra.mrb[16].mxu0 %v7130_v26  ;;  %v7135_v26 = vld [vmem:[#allocation34_spill] sm:$0xff] }
 0x34b   : > { %4827 = vmatpush3.bf16.msra.mxu0 %v6588_v58  ;;  %4545 = vmatprep.mubr.f32.mxu0 %v7131_v43  ;;  %v7138_v43 = vld [vmem:[#allocation37_spill] sm:$0xff] }
 0x34c   : > { %4829 = vmatprep.subr.bf16.mxu0 %v6586_v19 }
 0x34e   : > { %4546 = vmatmul.mubr.f32.gmra.mrb[12].mxu0 %v7132_v23  ;;  %v7139_v23 = vld [vmem:[#allocation42_spill] sm:$0xff] }
 0x34f   : > { %4552 = vmatprep.mubr.f32.mxu0 %v7121_v61 }
 0x352   : > { %4553 = vmatmul.mubr.f32.vlgmr.msra.gmra.mrb[16].mxu0 %v7122_v56 }
 0x353   : > { %4831 = vmatpush3.bf16.msra.mxu0 %v6586_v19  ;;  %4555 = vmatprep.mubr.f32.mxu0 %v7123_v30 }
 0x354   : > { %4929 = vmatprep.subr.bf16.mxu0 %v7078_v7 }
 0x356   : > { %4556 = vmatmul.mubr.f32.gmra.mrb[12].mxu0 %v7124_v29 }
 0x357   : > { %4562 = vmatprep.mubr.f32.mxu0 %v7121_v61 }
 0x35a   : > { %4563 = vmatmul.mubr.f32.vlgmr.msra.gmra.mrb[16].mxu0 %v7122_v56 }
 0x35b   : > { %4565 = vmatprep.mubr.f32.mxu0 %v7123_v30 }
 0x35c   : > { %4931 = vmatpush1.bf16.xpose.msra.mxu0 %v6060_v52 }
 0x35d   : > { %4933 = vmatprep.subr.bf16.mxu0 %v6030_v50 }
 0x35e   : > { %4566 = vmatmul.mubr.f32.gmra.mrb[12].mxu0 %v7124_v29 }
 0x364   : > { %4935 = vmatpush1.bf16.xpose.msra.mxu0 %v6123_v47 }
 0x365   : > { %4937 = vmatprep.subr.bf16.mxu0 %v6133_v40 }
 0x36c   : > { %4939 = vmatpush1.bf16.xpose.msra.mxu0 %v6150_v42 }
 0x36d   : > { %4941 = vmatprep.subr.bf16.mxu0 %v6158_v4 }
 0x374   : > { %4943 = vmatpush1.bf16.xpose.msra.mxu0 %v6169_v53 }
 0x375   : > { %4945 = vmatprep.subr.bf16.mxu0 %v6176_v37 }
 0x37c   : > { %4947 = vmatpush1.bf16.xpose.msra.mxu0 %v6191_v3 }
 0x37d   : > { %4949 = vmatprep.subr.bf16.mxu0 %v6185_v35 }
 0x384   : > { %4951 = vmatpush1.bf16.xpose.msra.mxu0 %v6228_v20 }
 0x385   : > { %4953 = vmatprep.subr.bf16.mxu0 %v6090_v48 }
 0x38c   : > { %4955 = vmatpush1.bf16.xpose.msra.mxu0 %v6243_v18 }
 0x38d   : > { %4957 = vmatprep.subr.bf16.mxu0 %v6246_v54 }
 0x394   : > { %4959 = vmatpush1.bf16.xpose.msra.mxu0 %v6250_v1 }
 0x395   : > { %4961 = vmatprep.subr.bf16.mxu0 %v6403_v33 }
 0x401   : > { %v4507_v19 = vpop.f32.mrb[14].mxu0 }
 0x402   : > { %v2593_v45 = vpop.f32.mrb[15].mxu0 }
 0x42d   : > { %v4564_v27 = vpop.f32.mrb[16].mxu0 }
 0x42e   : > { %v3196_v39 = vsub.f32 %v4564_v27, %v4507_v19  ;;  %v3169_v34 = vpop.f32.mrb[17].mxu0 }
 0x42f   : > { %v3195_v31 = vsub.f32 %v3169_v34, %v2593_v45 }
 0x430   : > { %v6662_v51 = vand.u32 4294901760, %v3196_v39 }
 0x431   : > { %v6664_v58 = vand.u32 4294901760, %v3195_v31  ;;  %v4567_v21 = vpop.f32.mrb[12].mxu0 }
 0x432   : > { %v6667_v25 = vsub.f32 %v3196_v39, %v6662_v51  ;;  %v6669_v63 = vand.u32 4294901760, %v4567_v21  ;;  %v3181_v12 = vpop.f32.mrb[13].mxu0 }
 0x433   : > { %v6672_v57 = vsub.f32 %v3195_v31, %v6664_v58  ;;  %v6674_v33 = vand.u32 4294901760, %v3181_v12 }
 0x434   : > { %v6677_v32 = vsub.f32 %v4567_v21, %v6669_v63  ;;  %v3316_v44 = vand.u32 4294901760, %v6667_v25 }
 0x435   : > { %v6681_v15 = vsub.f32 %v3181_v12, %v6674_v33  ;;  %v3301_v36 = vand.u32 4294901760, %v6672_v57 }
 0x436   : > { %v3322_v61 = vand.u32 4294901760, %v6677_v32  ;;  %v3317_v56 = vsub.f32 %v6667_v25, %v3316_v44 }
 0x437   : > { %v3307_v59 = vand.u32 4294901760, %v6681_v15  ;;  %3815 = vmatprep.mubr.f32.mxu0 %v3301_v36  ;;  %v3302_v28 = vsub.f32 %v6672_v57, %v3301_v36 }
 0x438   : > { %v3323_v24 = vsub.f32 %v6677_v32, %v3322_v61  ;;  %v3318_v9 = vand.u32 4294901760, %v3317_v56 }
 0x439   : > { %v3308_v30 = vsub.f32 %v6681_v15, %v3307_v59  ;;  %3819 = vmatmul.mubr.f32.vlgmr.msra.gmra.mrb[18].mxu0 %v3307_v59  ;;  %v3303_v29 = vand.u32 4294901760, %v3302_v28 }
 0x43a   : > { %4963 = vmatpush1.bf16.xpose.msra.mxu0 %v6410_v8  ;;  %3826 = vmatprep.mubr.f32.mxu0 %v3316_v44  ;;  %v3324_v55 = vand.u32 4294901760, %v3323_v24  ;;  %v7137_v8 = vld [vmem:[#allocation36_spill] sm:$0xff] }
 0x43b   : > { %v3309_v49 = vand.u32 4294901760, %v3308_v30  ;;  %3304 = vmatprep.mubr.f32.mxu1 %v3303_v29  ;;  %4965 = vmatprep.subr.bf16.mxu0 %v6417_v14  ;;  %v7136_v14 = vld [vmem:[#allocation35_spill] sm:$0xff] }
 0x43d   : > { %3310 = vmatmul.mubr.f32.vlgmr.msra.gmra.mrb[12].mxu1 %v3309_v49  ;;  %3830 = vmatmul.mubr.f32.gmra.mrb[20].mxu0 %v3322_v61 }
 0x43e   : > { %4867 = vmatpush1.bf16.xpose.msra.mxu1 %v7134_v17  ;;  %3319 = vmatprep.mubr.f32.mxu1 %v3318_v9 }
 0x43f   : > { %3996 = vmatprep.mubr.f32.mxu0 %v6664_v58  ;;  %4869 = vmatprep.subr.bf16.mxu1 %v7135_v26 }
 0x441   : > { %3325 = vmatmul.mubr.f32.gmra.mrb[14].mxu1 %v3324_v55 }
 0x442   : > { %4967 = vmatpush1.bf16.xpose.msra.mxu0 %v6427_v60  ;;  %3555 = vmatprep.mubr.f32.mxu1 %v6664_v58  ;;  %v7140_v60 = vld [vmem:[#allocation43_spill] sm:$0xff] }
 0x443   : > { %4969 = vmatprep.subr.bf16.mxu0 %v6434_v10  ;;  %v7142_v10 = vld [vmem:[#allocation47_spill] sm:$0xff] }
 0x446   : > { %4871 = vmatpush1.bf16.xpose.msra.mxu1 %v7136_v14 }
 0x447   : > { %4873 = vmatprep.subr.bf16.mxu1 %v7137_v8 }
 0x44a   : > { %4971 = vmatpush1.bf16.xpose.msra.mxu0 %v6444_v5  ;;  %v7143_v5 = vld [vmem:[#allocation48_spill] sm:$0xff] }
 0x44b   : > { %4973 = vmatprep.subr.bf16.mxu0 %v6451_v22  ;;  %v7144_v22 = vld [vmem:[#allocation49_spill] sm:$0xff] }
 0x44e   : > { %4875 = vmatpush1.bf16.xpose.msra.mxu1 %v7138_v43 }
 0x44f   : > { %4877 = vmatprep.subr.bf16.mxu1 %v7139_v23 }
 0x452   : > { %4975 = vmatpush1.bf16.xpose.msra.mxu0 %v6461_v38  ;;  %v7145_v38 = vld [vmem:[#allocation50_spill] sm:$0xff] }
 0x453   : > { %4977 = vmatprep.subr.bf16.mxu0 %v6468_v2  ;;  %v7146_v2 = vld [vmem:[#allocation51_spill] sm:$0xff] }
 0x456   : > { %4879 = vmatpush1.bf16.xpose.msra.mxu1 %v7140_v60 }
 0x457   : > { %4881 = vmatprep.subr.bf16.mxu1 %v7141_v13 }
 0x45a   : > { %4979 = vmatpush1.bf16.xpose.msra.mxu0 %v6477_v62  ;;  %v7147_v62 = vld [vmem:[#allocation52_spill] sm:$0xff] }
 0x45b   : > { %4981 = vmatprep.subr.bf16.mxu0 %v6485_v41  ;;  %v7148_v41 = vld [vmem:[#allocation53_spill] sm:$0xff] }
 0x45e   : > { %4883 = vmatpush1.bf16.xpose.msra.mxu1 %v7142_v10 }
 0x45f   : > { %4885 = vmatprep.subr.bf16.mxu1 %v7143_v5 }
 0x462   : > { %4983 = vmatpush1.bf16.xpose.msra.mxu0 %v6492_v46  ;;  %v7149_v46 = vld [vmem:[#allocation54_spill] sm:$0xff] }
 0x463   : > { %4985 = vmatprep.subr.bf16.mxu0 %v6499_v0  ;;  %v7150_v0 = vld [vmem:[#allocation58_spill] sm:$0xff] }
 0x466   : > { %4887 = vmatpush1.bf16.xpose.msra.mxu1 %v7144_v22 }
 0x467   : > { %4889 = vmatprep.subr.bf16.mxu1 %v7145_v38 }
 0x46a   : > { %4987 = vmatpush1.bf16.xpose.msra.mxu0 %v6506_v6  ;;  %v7154_v6 = vld [vmem:[#allocation63_spill] sm:$0xff] }
 0x46b   : > { %4989 = vmatprep.subr.bf16.mxu0 %v6513_v16  ;;  %v7155_v16 = vld [vmem:[#allocation64_spill] sm:$0xff] }
 0x46e   : > { %4891 = vmatpush1.bf16.xpose.msra.mxu1 %v7146_v2 }
 0x46f   : > { %4893 = vmatprep.subr.bf16.mxu1 %v7147_v62 }
 0x472   : > { %4991 = vmatpush1.bf16.xpose.msra.mxu0 %v6520_v11  ;;  %v7156_v11 = vld [vmem:[#allocation65_spill] sm:$0xff] }
 0x473   : > { %4993 = vmatprep.subr.bf16.mxu0 %v7078_v7  ;;  %v7151_v7 = vld [vmem:[#allocation59_spill] sm:$0xff] }
 0x476   : > { %4895 = vmatpush1.bf16.xpose.msra.mxu1 %v7148_v41 }
 0x477   : > { %4897 = vmatprep.subr.bf16.mxu1 %v7149_v46 }
 0x479   : > { %3998 = vmatmul.mubr.f32.vlgmr.msra.gmra.mrb[18].mxu0 %v6674_v33 }
 0x47a   : > { %4003 = vmatprep.mubr.f32.mxu0 %v6662_v51  ;;  %4995 = vmatpush1.bf16.xpose.msra.mxu0 %v6060_v52  ;;  %v7153_v52 = vld [vmem:[#allocation61_spill] sm:$0xff] }
 0x47b   : > { %4997 = vmatprep.subr.bf16.mxu0 %v6030_v50  ;;  %v7152_v50 = vld [vmem:[#allocation60_spill] sm:$0xff] }
 0x47d   : > { %3557 = vmatmul.mubr.f32.vlgmr.msra.gmra.mrb[12].mxu1 %v6674_v33  ;;  %4005 = vmatmul.mubr.f32.gmra.mrb[20].mxu0 %v6669_v63 }
 0x47e   : > { %3562 = vmatprep.mubr.f32.mxu1 %v6662_v51  ;;  %4899 = vmatpush1.bf16.xpose.msra.mxu1 %v7150_v0 }
 0x47f   : > { %4107 = vmatprep.mubr.f32.mxu0 %v6664_v58  ;;  %4901 = vmatprep.subr.bf16.mxu1 %v7151_v7 }
 0x481   : > { %3564 = vmatmul.mubr.f32.gmra.mrb[14].mxu1 %v6669_v63 }
 0x482   : > { %3699 = vmatprep.mubr.f32.mxu1 %v6672_v57  ;;  %4999 = vmatpush1.bf16.xpose.msra.mxu0 %v6123_v47  ;;  %v7157_v47 = vld [vmem:[#allocation38_spill] sm:$0xff] }
 0x483   : > { %5001 = vmatprep.subr.bf16.mxu0 %v6133_v40  ;;  %v7158_v40 = vld [vmem:[#allocation39_spill] sm:$0xff] }
 0x486   : > { %4903 = vmatpush1.bf16.xpose.msra.mxu1 %v7152_v50 }
 0x487   : > { %4905 = vmatprep.subr.bf16.mxu1 %v7153_v52 }
 0x48a   : > { %5003 = vmatpush1.bf16.xpose.msra.mxu0 %v6150_v42  ;;  %v7159_v42 = vld [vmem:[#allocation40_spill] sm:$0xff] }
 0x48b   : > { %5005 = vmatprep.subr.bf16.mxu0 %v6158_v4  ;;  %v7160_v4 = vld [vmem:[#allocation44_spill] sm:$0xff] }
 0x48e   : > { %4907 = vmatpush1.bf16.xpose.msra.mxu1 %v7154_v6 }
 0x48f   : > { %4909 = vmatprep.subr.bf16.mxu1 %v7155_v16 }
 0x492   : > { %5007 = vmatpush1.bf16.xpose.msra.mxu0 %v6169_v53  ;;  %v7161_v53 = vld [vmem:[#allocation45_spill] sm:$0xff] }
 0x493   : > { %5009 = vmatprep.subr.bf16.mxu0 %v6176_v37  ;;  %v7162_v37 = vld [vmem:[#allocation66_spill] sm:$0xff] }
 0x496   : > { %4911 = vmatpush1.bf16.xpose.msra.mxu1 %v7156_v11 }
 0x497   : > { %4913 = vmatprep.subr.bf16.mxu1 %v7157_v47 }
 0x49a   : > { %5011 = vmatpush1.bf16.xpose.msra.mxu0 %v6191_v3  ;;  %v7164_v3 = vld [vmem:[#allocation56_spill] sm:$0xff] }
 0x49b   : > { %5013 = vmatprep.subr.bf16.mxu0 %v6185_v35  ;;  %v7163_v35 = vld [vmem:[#allocation55_spill] sm:$0xff] }
 0x49e   : > { %4915 = vmatpush1.bf16.xpose.msra.mxu1 %v7158_v40 }
 0x49f   : > { %4917 = vmatprep.subr.bf16.mxu1 %v7159_v42 }
 0x4a2   : > { %5015 = vmatpush1.bf16.xpose.msra.mxu0 %v6228_v20 }
 0x4a3   : > { %5017 = vmatprep.subr.bf16.mxu0 %v6090_v48 }
 0x4a6   : > { %4919 = vmatpush1.bf16.xpose.msra.mxu1 %v7160_v4 }
 0x4a7   : > { %4921 = vmatprep.subr.bf16.mxu1 %v7161_v53 }
 0x4aa   : > { %5019 = vmatpush1.bf16.xpose.msra.mxu0 %v6243_v18 }
 0x4ab   : > { %5021 = vmatprep.subr.bf16.mxu0 %v6246_v54 }
 0x4ae   : > { %4923 = vmatpush1.bf16.xpose.msra.mxu1 %v7162_v37 }
 0x4af   : > { %4925 = vmatprep.subr.bf16.mxu1 %v7163_v35 }
 0x4b2   : > { %5023 = vmatpush1.bf16.xpose.msra.mxu0 %v6250_v1 }
 0x4b6   : > { %4927 = vmatpush1.bf16.xpose.msra.mxu1 %v7164_v3 }
 0x4b9   : > { %4109 = vmatmul.mubr.f32.vlgmr.msra.gmra.mrb[18].mxu0 %v6674_v33 }
 0x4ba   : > { %4114 = vmatprep.mubr.f32.mxu0 %v6662_v51 }
 0x4bd   : > { %3702 = vmatmul.mubr.f32.vlgmr.msra.gmra.mrb[12].mxu1 %v6681_v15  ;;  %4116 = vmatmul.mubr.f32.gmra.mrb[20].mxu0 %v6669_v63 }
 0x4be   : > { %3708 = vmatprep.mubr.f32.mxu1 %v6667_v25 }
 0x4c1   : > { %3711 = vmatmul.mubr.f32.gmra.mrb[14].mxu1 %v6677_v32 }
 0x58c   : > { %v4110_v20 = vpop.f32.mrb[18].mxu0 }
 0x58d   : > { %v4112_v48 = vpop.f32.mrb[19].mxu0 }
 0x590   : > { %v3703_v18 = vpop.f32.mrb[12].mxu1  ;;  %v4117_v54 = vpop.f32.mrb[20].mxu0 }
 0x591   : > { %v5036_v1 = vadd.f32 %v4110_v20, %v3703_v18  ;;  %v3705_v19 = vpop.f32.mrb[13].mxu1  ;;  %v4119_v45 = vpop.f32.mrb[21].mxu0 }
 0x593   : > { %4121 = vst [vmem:[%s338_s16] sm:$0xff] %v5036_v1 }
 0x594   : > { %v3712_v27 = vpop.f32.mrb[14].mxu1 }
 0x595   : > { %v5037_v39 = vadd.f32 %v4117_v54, %v3712_v27  ;;  %v3714_v34 = vpop.f32.mrb[15].mxu1 }
 0x597   : > { %4122 = vst [vmem:[%s338_s16 + $0x8] sm:$0xff] %v5037_v39 }
 0x598   : > { %5314 = shalt.err (!%p5311_p8)
}
 0x599   : > { %s5315_s12 = scalar_lea.hbm %s6775_s10, 256  ;;  %s5319_s29 = scalar_lea.hbm %s6825_s6, 512 }
 0x59a   : > { %p5316_p10 = scmp.ne.s32.totalorder %s6775_s10, %s5315_s12  ;;  %p5320_p11 = scmp.lt.u32.totalorder %s6775_s10, %s6825_s6 }
 0x59b   : > { %p5321_p13 = scmp.lt.u32.totalorder %s5319_s29, %s5315_s12  ;;  %p5323_p7 = scmp.lt.u32.totalorder %s5315_s12, %s6775_s10 }
 0x59c   : > { %p5317_p0 = pnand %p5316_p10, %p5514_p12 }
 0x59d   : > { %p5322_p3 = por %p5321_p13, %p5320_p11 }
 0x59e   : > { %p5318_p4 = pneg %p5317_p0 }
 0x59f   : > { %p5324_p9 = por %p5323_p7, %p5322_p3 }
 0x5a1   : > { %p5325_p1 = pnand %p5324_p9, %p5318_p4 }
 0x5a3   : > { %5328 = shalt.err (!%p5325_p1)
}
 0x5a4   : > { %s5386_s18 = smov 128   ;;  %s5387_s16 = smov 8  }
 0x5a5   : > { %5152 = dma.vmem_to_hbm [thread:$0]  (%p5514_p12), %s6770_s26, 256, %s6775_s10, %s4124_s7, %s5386_s18, %s5386_s18, %s5387_s16  }
 0x5a6 PF: > { %s4152_s11 = sand.u32 1, %s5363_s21   ;;  %p7165_p5 = scmp.ne.s32.totalorder %s6966_s28, 0 }
 0x5a7   : > { %p7166_p2 = scmp.ge.s32.totalorder %s5375_s24, 2  ;;  %s4153_s20 = scalar_lea.sflag [#allocation6], %s4152_s11 }
 0x5a9   : > { %p5166_p6 = pnand %p7166_p2, %p7165_p5 }
 0x5ab   : > { %5358 = dma.done.wait (!%p5166_p6), %s4153_s20, 256  }
 0x5ac   : > { %5360 = vsyncadd (!%p5166_p6), %s4153_s20, 4294967040  ;;  %s7167_s27 = sld [smem:[#allocation15_spill]]  ;;  %p22_p8 = scmp.ge.s32.totalorder %s5479_s9, 4  }
 0x5ad   : > { %s7168_s21 = smov %s5367_s22  ;;  %s7169_s22 = smov %s5371_s23 }
 0x5ae   : > { %s7171_s24 = smov %s5479_s9  ;;  %24 = sbr.rel (!%p22_p8) target bundleno = 10 (0xa), region = 109 }
 0x5b2   : > { %s7170_s23 = smov %s7167_s27 }
 0x5b5   :  { %4158 = vsyncpa [#allocation5], 1 }
 0x5b6   :  { %4160 = vsyncpa [#allocation5 + $0x1], 1 }
 0x5b7   :  { %4161 = vsyncpa [#allocation8], 1 }
 0x5b8   :  { %4163 = vsyncpa [#allocation8 + $0x1], 1 }
 0x5b9   :  { %4164 = vsyncpa [#allocation6], 1 }
 0x5ba   :  { %4166 = vsyncpa [#allocation6 + $0x1], 1 }

</bundles_post_ra>
